<compile_context>
chip_gen: v5e
topology: v5e:2x2
jax: 0.10.0
libtpu: 0.0.40
codegen_flags: <defaults>
</compile_context>

<pallas_src>
import jax
import jax.numpy as jnp
from jax import lax
from jax.experimental import pallas as pl
from jax.experimental.pallas import tpu as pltpu


def _diving_kernel(w1_ref, b1_ref, w2_ref, b2_ref,          # SMEM: (H,) (H,) (H,) (1,)
                   x_ref, adjT_ref, whT_ref, bh_ref, woT_ref, bo_ref,  # VMEM
                   out_ref):
    x = x_ref[...]                         # (TB, N)  bf16 (MXU operand)
    adjT = adjT_ref[...]                   # (N, N)   bf16, adj transposed host-side

    # --- GCN layer 1, adj contraction --------------------------------------
    # adj @ (x_b[:,None] * w1) == (adj @ x_b)[:,None] * w1  ->  one MXU matmul
    A = jnp.dot(x, adjT, preferred_element_type=jnp.float32)          # (TB, N) f32

    # --- Fused GCN layer-1 expansion + relu + layer-2 contraction over H ----
    # S2 = sum_h relu(A * w1[h] + b1[h]) * w2[h], on 2-D lane-dense tiles.
    # (No (B,N,H) intermediate, no lane->sublane relayout, no XLU reduce.)
    H = w1_ref.shape[0]

    def h_step(h, s2):
        return s2 + jnp.maximum(A * w1_ref[h] + b1_ref[h], 0.0) * w2_ref[h]

    S2 = lax.fori_loop(0, H, h_step, jnp.zeros_like(A), unroll=True)   # (TB, N) f32

    # --- GCN layer 2, adj contraction (+ scalar bias from SMEM) -------------
    G2 = jnp.dot(S2.astype(adjT.dtype), adjT,
                 preferred_element_type=jnp.float32) + b2_ref[0]       # (TB, N) f32

    # --- MLP (dropout = identity in eval mode) ------------------------------
    H3 = jnp.maximum(
        jnp.dot(G2.astype(whT_ref.dtype), whT_ref[...],
                preferred_element_type=jnp.float32) + bh_ref[...], 0.0)  # (TB, L)
    O2 = jnp.dot(H3.astype(woT_ref.dtype), woT_ref[...],
                 preferred_element_type=jnp.float32) + bo_ref[...]       # (TB, O)

    out_ref[...] = jax.nn.sigmoid(O2)


def diving_forward(x, adj, params, *, tile_b=8):
    B, N = x.shape
    H = params["w1"].shape[-1]
    L = params["whT"].shape[-1]
    n_out = params["bo"].shape[-1]

    TB = tile_b if (B % tile_b == 0) else B
    grid = (B // TB,)

    mxu_dtype = jnp.bfloat16
    # Host-side prep: MXU operands in bf16, adj transposed once.
    x_m = x.astype(mxu_dtype)
    adjT = adj.T.astype(mxu_dtype)                         # (N, N)
    whT = params["whT"].astype(mxu_dtype)                  # (N, L)
    woT = params["woT"].astype(mxu_dtype)                  # (L, O)

    # GCN parameters flattened to SMEM scalar vectors for the fused H-loop.
    w1 = params["w1"].reshape(H).astype(jnp.float32)
    b1 = params["b1"].reshape(H).astype(jnp.float32)
    w2 = params["w2"].reshape(H).astype(jnp.float32)
    b2 = params["b2"].reshape(1).astype(jnp.float32)
    bh = params["bh"].astype(jnp.float32)                  # (1, L)
    bo = params["bo"].astype(jnp.float32)                  # (1, O)

    smem = pl.BlockSpec(memory_space=pltpu.MemorySpace.SMEM)
    in_specs = [
        smem, smem, smem, smem,                                  # w1, b1, w2, b2
        pl.BlockSpec((TB, N), lambda i: (i, 0)),                 # x   (batch-tiled)
        pl.BlockSpec((N, N), lambda i: (0, 0)),                  # adjT (VMEM-resident)
        pl.BlockSpec((N, L), lambda i: (0, 0)),                  # whT
        pl.BlockSpec((1, L), lambda i: (0, 0)),                  # bh
        pl.BlockSpec((L, n_out), lambda i: (0, 0)),              # woT
        pl.BlockSpec((1, n_out), lambda i: (0, 0)),              # bo
    ]
    out_spec = pl.BlockSpec((TB, n_out), lambda i: (i, 0))

    # At these sizes the default VMEM limit is ample; raise vmem_limit_bytes
    # (and add a K-reduction grid axis over adjT) once N reaches the thousands.
    return pl.pallas_call(
        _diving_kernel,
        grid=grid,
        in_specs=in_specs,
        out_specs=out_spec,
        out_shape=jax.ShapeDtypeStruct((B, n_out), jnp.float32),
        compiler_params=pltpu.CompilerParams(
            dimension_semantics=("parallel",),
        ),
    )(w1, b1, w2, b2, x_m, adjT, whT, bh, woT, bo)


def init_params(key, nfeat, nhid, nclass, n_nodes, n_out, nlhid):
    k1, k2, k3, k4 = jax.random.split(key, 4)

    def xavier_uniform(k, shape):
        fan_in, fan_out = shape
        lim = (6.0 / (fan_in + fan_out)) ** 0.5
        return jax.random.uniform(k, shape, jnp.float32, -lim, lim)

    return dict(
        # GCN layers: xavier_uniform weights, zero bias
        w1=xavier_uniform(k1, (nfeat, nhid)),        # (1, H)
        b1=jnp.zeros((1, nhid), jnp.float32),
        w2=xavier_uniform(k2, (nhid, nclass)),       # (H, 1)
        b2=jnp.zeros((nclass,), jnp.float32),        # (1,)
        # MLP Linear layers: N(0, 0.02) weights (stored transposed), zero bias
        whT=0.02 * jax.random.normal(k3, (n_nodes, nlhid), jnp.float32),
        bh=jnp.zeros((1, nlhid), jnp.float32),
        woT=0.02 * jax.random.normal(k4, (nlhid, n_out), jnp.float32),
        bo=jnp.zeros((1, n_out), jnp.float32),
    )


def reference_forward(x, adj, p):
    """Pure-JAX f32 reference mirroring the PyTorch forward (eval mode)."""
    xu = x[:, :, None]                                            # (B, N, 1)
    sup = jnp.einsum("bni,ih->bnh", xu, p["w1"])                  # (B, N, H)
    h1 = jax.nn.relu(jnp.einsum("mn,bnh->bmh", adj, sup) + p["b1"][0])
    s2 = jnp.einsum("bnh,hc->bnc", h1, p["w2"])                   # (B, N, 1)
    g2 = jnp.einsum("mn,bnc->bmc", adj, s2) + p["b2"]             # (B, N, 1)
    o1 = g2[:, :, 0]                                              # squeeze(2)
    h3 = jax.nn.relu(o1 @ p["whT"] + p["bh"][0])
    o2 = h3 @ p["woT"] + p["bo"][0]
    return jax.nn.sigmoid(o2)


if __name__ == "__main__":
    # nfeat=1, nclass=1 are implied by the unsqueeze(2)/squeeze(2) in the
    # forward.  B=16 / N=128 keeps the test small but gives real (8,128)
    # lane-dense tiles and a 2-step batch grid.
    B, N_NODES, N_HID, N_LHID, N_OUT = 16, 128, 32, 32, 8
    NFEAT, NCLASS = 1, 1

    key = jax.random.PRNGKey(0)
    kx, kadj, kparam = jax.random.split(key, 3)

    x = jax.random.normal(kx, (B, N_NODES), jnp.float32)
    adj = jax.random.uniform(kadj, (N_NODES, N_NODES), jnp.float32)
    params = init_params(kparam, NFEAT, N_HID, NCLASS, N_NODES, N_OUT, N_LHID)

    out = jax.block_until_ready(diving_forward(x, adj, params))
    ref = reference_forward(x, adj, params)

    assert out.shape == (B, N_OUT)
    # bf16 MXU operands with f32 accumulation -> loosened tolerance vs f32 ref
    # (sigmoid saturation keeps absolute error small).
    err = float(jnp.max(jnp.abs(out - ref)))
    assert jnp.allclose(out, ref, atol=2e-2, rtol=2e-2), (
        f"mismatch: max abs err {err}")

    print("KERNEL_OK")
</pallas_src>

<mosaic_0001>
module attributes {stable_mosaic.version = 11 : i64} {
  func.func @_diving_kernel(%arg0: i32, %arg1: memref<32xf32, #tpu.memory_space<smem>>, %arg2: memref<32xf32, #tpu.memory_space<smem>>, %arg3: memref<32xf32, #tpu.memory_space<smem>>, %arg4: memref<1xf32, #tpu.memory_space<smem>>, %arg5: memref<8x128xbf16, #tpu.memory_space<vmem>>, %arg6: memref<128x128xbf16, #tpu.memory_space<vmem>>, %arg7: memref<128x32xbf16, #tpu.memory_space<vmem>>, %arg8: memref<1x32xf32, #tpu.memory_space<vmem>>, %arg9: memref<32x8xbf16, #tpu.memory_space<vmem>>, %arg10: memref<1x8xf32, #tpu.memory_space<vmem>>, %arg11: memref<8x8xf32, #tpu.memory_space<vmem>>) attributes {dimension_semantics = [#tpu.dimension_semantics<parallel>], iteration_bounds = array<i64: 2>, scalar_prefetch = 0 : i64, scratch_operands = 0 : i64, tpu.core_type = #tpu.core_type<tc>, window_params = [{transform_indices = @transform_0, window_bounds = array<i64: 32>}, {transform_indices = @transform_1, window_bounds = array<i64: 32>}, {transform_indices = @transform_2, window_bounds = array<i64: 32>}, {transform_indices = @transform_3, window_bounds = array<i64: 1>}, {transform_indices = @transform_4, window_bounds = array<i64: 8, 128>}, {pipeline_mode = #tpu.pipeline_mode<synchronous>, transform_indices = @transform_5, window_bounds = array<i64: 128, 128>}, {pipeline_mode = #tpu.pipeline_mode<synchronous>, transform_indices = @transform_6, window_bounds = array<i64: 128, 32>}, {pipeline_mode = #tpu.pipeline_mode<synchronous>, transform_indices = @transform_7, window_bounds = array<i64: 1, 32>}, {pipeline_mode = #tpu.pipeline_mode<synchronous>, transform_indices = @transform_8, window_bounds = array<i64: 32, 8>}, {pipeline_mode = #tpu.pipeline_mode<synchronous>, transform_indices = @transform_9, window_bounds = array<i64: 1, 8>}, {transform_indices = @transform_10, window_bounds = array<i64: 8, 8>}]} {
    %c0 = arith.constant 0 : index
    %c0_0 = arith.constant 0 : index
    %0 = vector.load %arg5[%c0, %c0_0] : memref<8x128xbf16, #tpu.memory_space<vmem>>, vector<8x128xbf16>
    %c0_1 = arith.constant 0 : index
    %c0_2 = arith.constant 0 : index
    %1 = vector.load %arg6[%c0_1, %c0_2] : memref<128x128xbf16, #tpu.memory_space<vmem>>, vector<128x128xbf16>
    %cst = arith.constant dense<0.000000e+00> : vector<8x128xf32>
    %2 = tpu.matmul %0, %1, %cst {dimension_numbers = #tpu.dot_dimension_numbers<[1], [0], [0], [1], [0, 0, 1, 1], [], []>} : vector<8x128xbf16>, vector<128x128xbf16>, vector<8x128xf32> -> vector<8x128xf32>
    %cst_3 = arith.constant 0.000000e+00 : f32
    %3 = vector.broadcast %cst_3 : f32 to vector<8x128xf32>
    %c0_i32 = arith.constant 0 : i32
    %4 = arith.index_cast %c0_i32 : i32 to index
    %5 = memref.load %arg1[%4] : memref<32xf32, #tpu.memory_space<smem>>
    %6 = vector.broadcast %5 : f32 to vector<8x128xf32>
    %7 = arith.mulf %2, %6 : vector<8x128xf32>
    %8 = arith.index_cast %c0_i32 : i32 to index
    %9 = memref.load %arg2[%8] : memref<32xf32, #tpu.memory_space<smem>>
    %10 = vector.broadcast %9 : f32 to vector<8x128xf32>
    %11 = arith.addf %7, %10 : vector<8x128xf32>
    %cst_4 = arith.constant 0.000000e+00 : f32
    %12 = vector.broadcast %cst_4 : f32 to vector<8x128xf32>
    %13 = arith.maximumf %11, %12 : vector<8x128xf32>
    %14 = arith.index_cast %c0_i32 : i32 to index
    %15 = memref.load %arg3[%14] : memref<32xf32, #tpu.memory_space<smem>>
    %16 = vector.broadcast %15 : f32 to vector<8x128xf32>
    %17 = arith.mulf %13, %16 : vector<8x128xf32>
    %18 = arith.addf %3, %17 : vector<8x128xf32>
    %c1_i32 = arith.constant 1 : i32
    %19 = arith.index_cast %c1_i32 : i32 to index
    %20 = memref.load %arg1[%19] : memref<32xf32, #tpu.memory_space<smem>>
    %21 = vector.broadcast %20 : f32 to vector<8x128xf32>
    %22 = arith.mulf %2, %21 : vector<8x128xf32>
    %23 = arith.index_cast %c1_i32 : i32 to index
    %24 = memref.load %arg2[%23] : memref<32xf32, #tpu.memory_space<smem>>
    %25 = vector.broadcast %24 : f32 to vector<8x128xf32>
    %26 = arith.addf %22, %25 : vector<8x128xf32>
    %cst_5 = arith.constant 0.000000e+00 : f32
    %27 = vector.broadcast %cst_5 : f32 to vector<8x128xf32>
    %28 = arith.maximumf %26, %27 : vector<8x128xf32>
    %29 = arith.index_cast %c1_i32 : i32 to index
    %30 = memref.load %arg3[%29] : memref<32xf32, #tpu.memory_space<smem>>
    %31 = vector.broadcast %30 : f32 to vector<8x128xf32>
    %32 = arith.mulf %28, %31 : vector<8x128xf32>
    %33 = arith.addf %18, %32 : vector<8x128xf32>
    %c2_i32 = arith.constant 2 : i32
    %34 = arith.index_cast %c2_i32 : i32 to index
    %35 = memref.load %arg1[%34] : memref<32xf32, #tpu.memory_space<smem>>
    %36 = vector.broadcast %35 : f32 to vector<8x128xf32>
    %37 = arith.mulf %2, %36 : vector<8x128xf32>
    %38 = arith.index_cast %c2_i32 : i32 to index
    %39 = memref.load %arg2[%38] : memref<32xf32, #tpu.memory_space<smem>>
    %40 = vector.broadcast %39 : f32 to vector<8x128xf32>
    %41 = arith.addf %37, %40 : vector<8x128xf32>
    %cst_6 = arith.constant 0.000000e+00 : f32
    %42 = vector.broadcast %cst_6 : f32 to vector<8x128xf32>
    %43 = arith.maximumf %41, %42 : vector<8x128xf32>
    %44 = arith.index_cast %c2_i32 : i32 to index
    %45 = memref.load %arg3[%44] : memref<32xf32, #tpu.memory_space<smem>>
    %46 = vector.broadcast %45 : f32 to vector<8x128xf32>
    %47 = arith.mulf %43, %46 : vector<8x128xf32>
    %48 = arith.addf %33, %47 : vector<8x128xf32>
    %c3_i32 = arith.constant 3 : i32
    %49 = arith.index_cast %c3_i32 : i32 to index
    %50 = memref.load %arg1[%49] : memref<32xf32, #tpu.memory_space<smem>>
    %51 = vector.broadcast %50 : f32 to vector<8x128xf32>
    %52 = arith.mulf %2, %51 : vector<8x128xf32>
    %53 = arith.index_cast %c3_i32 : i32 to index
    %54 = memref.load %arg2[%53] : memref<32xf32, #tpu.memory_space<smem>>
    %55 = vector.broadcast %54 : f32 to vector<8x128xf32>
    %56 = arith.addf %52, %55 : vector<8x128xf32>
    %cst_7 = arith.constant 0.000000e+00 : f32
    %57 = vector.broadcast %cst_7 : f32 to vector<8x128xf32>
    %58 = arith.maximumf %56, %57 : vector<8x128xf32>
    %59 = arith.index_cast %c3_i32 : i32 to index
    %60 = memref.load %arg3[%59] : memref<32xf32, #tpu.memory_space<smem>>
    %61 = vector.broadcast %60 : f32 to vector<8x128xf32>
    %62 = arith.mulf %58, %61 : vector<8x128xf32>
    %63 = arith.addf %48, %62 : vector<8x128xf32>
    %c4_i32 = arith.constant 4 : i32
    %64 = arith.index_cast %c4_i32 : i32 to index
    %65 = memref.load %arg1[%64] : memref<32xf32, #tpu.memory_space<smem>>
    %66 = vector.broadcast %65 : f32 to vector<8x128xf32>
    %67 = arith.mulf %2, %66 : vector<8x128xf32>
    %68 = arith.index_cast %c4_i32 : i32 to index
    %69 = memref.load %arg2[%68] : memref<32xf32, #tpu.memory_space<smem>>
    %70 = vector.broadcast %69 : f32 to vector<8x128xf32>
    %71 = arith.addf %67, %70 : vector<8x128xf32>
    %cst_8 = arith.constant 0.000000e+00 : f32
    %72 = vector.broadcast %cst_8 : f32 to vector<8x128xf32>
    %73 = arith.maximumf %71, %72 : vector<8x128xf32>
    %74 = arith.index_cast %c4_i32 : i32 to index
    %75 = memref.load %arg3[%74] : memref<32xf32, #tpu.memory_space<smem>>
    %76 = vector.broadcast %75 : f32 to vector<8x128xf32>
    %77 = arith.mulf %73, %76 : vector<8x128xf32>
    %78 = arith.addf %63, %77 : vector<8x128xf32>
    %c5_i32 = arith.constant 5 : i32
    %79 = arith.index_cast %c5_i32 : i32 to index
    %80 = memref.load %arg1[%79] : memref<32xf32, #tpu.memory_space<smem>>
    %81 = vector.broadcast %80 : f32 to vector<8x128xf32>
    %82 = arith.mulf %2, %81 : vector<8x128xf32>
    %83 = arith.index_cast %c5_i32 : i32 to index
    %84 = memref.load %arg2[%83] : memref<32xf32, #tpu.memory_space<smem>>
    %85 = vector.broadcast %84 : f32 to vector<8x128xf32>
    %86 = arith.addf %82, %85 : vector<8x128xf32>
    %cst_9 = arith.constant 0.000000e+00 : f32
    %87 = vector.broadcast %cst_9 : f32 to vector<8x128xf32>
    %88 = arith.maximumf %86, %87 : vector<8x128xf32>
    %89 = arith.index_cast %c5_i32 : i32 to index
    %90 = memref.load %arg3[%89] : memref<32xf32, #tpu.memory_space<smem>>
    %91 = vector.broadcast %90 : f32 to vector<8x128xf32>
    %92 = arith.mulf %88, %91 : vector<8x128xf32>
    %93 = arith.addf %78, %92 : vector<8x128xf32>
    %c6_i32 = arith.constant 6 : i32
    %94 = arith.index_cast %c6_i32 : i32 to index
    %95 = memref.load %arg1[%94] : memref<32xf32, #tpu.memory_space<smem>>
    %96 = vector.broadcast %95 : f32 to vector<8x128xf32>
    %97 = arith.mulf %2, %96 : vector<8x128xf32>
    %98 = arith.index_cast %c6_i32 : i32 to index
    %99 = memref.load %arg2[%98] : memref<32xf32, #tpu.memory_space<smem>>
    %100 = vector.broadcast %99 : f32 to vector<8x128xf32>
    %101 = arith.addf %97, %100 : vector<8x128xf32>
    %cst_10 = arith.constant 0.000000e+00 : f32
    %102 = vector.broadcast %cst_10 : f32 to vector<8x128xf32>
    %103 = arith.maximumf %101, %102 : vector<8x128xf32>
    %104 = arith.index_cast %c6_i32 : i32 to index
    %105 = memref.load %arg3[%104] : memref<32xf32, #tpu.memory_space<smem>>
    %106 = vector.broadcast %105 : f32 to vector<8x128xf32>
    %107 = arith.mulf %103, %106 : vector<8x128xf32>
    %108 = arith.addf %93, %107 : vector<8x128xf32>
    %c7_i32 = arith.constant 7 : i32
    %109 = arith.index_cast %c7_i32 : i32 to index
    %110 = memref.load %arg1[%109] : memref<32xf32, #tpu.memory_space<smem>>
    %111 = vector.broadcast %110 : f32 to vector<8x128xf32>
    %112 = arith.mulf %2, %111 : vector<8x128xf32>
    %113 = arith.index_cast %c7_i32 : i32 to index
    %114 = memref.load %arg2[%113] : memref<32xf32, #tpu.memory_space<smem>>
    %115 = vector.broadcast %114 : f32 to vector<8x128xf32>
    %116 = arith.addf %112, %115 : vector<8x128xf32>
    %cst_11 = arith.constant 0.000000e+00 : f32
    %117 = vector.broadcast %cst_11 : f32 to vector<8x128xf32>
    %118 = arith.maximumf %116, %117 : vector<8x128xf32>
    %119 = arith.index_cast %c7_i32 : i32 to index
    %120 = memref.load %arg3[%119] : memref<32xf32, #tpu.memory_space<smem>>
    %121 = vector.broadcast %120 : f32 to vector<8x128xf32>
    %122 = arith.mulf %118, %121 : vector<8x128xf32>
    %123 = arith.addf %108, %122 : vector<8x128xf32>
    %c8_i32 = arith.constant 8 : i32
    %124 = arith.index_cast %c8_i32 : i32 to index
    %125 = memref.load %arg1[%124] : memref<32xf32, #tpu.memory_space<smem>>
    %126 = vector.broadcast %125 : f32 to vector<8x128xf32>
    %127 = arith.mulf %2, %126 : vector<8x128xf32>
    %128 = arith.index_cast %c8_i32 : i32 to index
    %129 = memref.load %arg2[%128] : memref<32xf32, #tpu.memory_space<smem>>
    %130 = vector.broadcast %129 : f32 to vector<8x128xf32>
    %131 = arith.addf %127, %130 : vector<8x128xf32>
    %cst_12 = arith.constant 0.000000e+00 : f32
    %132 = vector.broadcast %cst_12 : f32 to vector<8x128xf32>
    %133 = arith.maximumf %131, %132 : vector<8x128xf32>
    %134 = arith.index_cast %c8_i32 : i32 to index
    %135 = memref.load %arg3[%134] : memref<32xf32, #tpu.memory_space<smem>>
    %136 = vector.broadcast %135 : f32 to vector<8x128xf32>
    %137 = arith.mulf %133, %136 : vector<8x128xf32>
    %138 = arith.addf %123, %137 : vector<8x128xf32>
    %c9_i32 = arith.constant 9 : i32
    %139 = arith.index_cast %c9_i32 : i32 to index
    %140 = memref.load %arg1[%139] : memref<32xf32, #tpu.memory_space<smem>>
    %141 = vector.broadcast %140 : f32 to vector<8x128xf32>
    %142 = arith.mulf %2, %141 : vector<8x128xf32>
    %143 = arith.index_cast %c9_i32 : i32 to index
    %144 = memref.load %arg2[%143] : memref<32xf32, #tpu.memory_space<smem>>
    %145 = vector.broadcast %144 : f32 to vector<8x128xf32>
    %146 = arith.addf %142, %145 : vector<8x128xf32>
    %cst_13 = arith.constant 0.000000e+00 : f32
    %147 = vector.broadcast %cst_13 : f32 to vector<8x128xf32>
    %148 = arith.maximumf %146, %147 : vector<8x128xf32>
    %149 = arith.index_cast %c9_i32 : i32 to index
    %150 = memref.load %arg3[%149] : memref<32xf32, #tpu.memory_space<smem>>
    %151 = vector.broadcast %150 : f32 to vector<8x128xf32>
    %152 = arith.mulf %148, %151 : vector<8x128xf32>
    %153 = arith.addf %138, %152 : vector<8x128xf32>
    %c10_i32 = arith.constant 10 : i32
    %154 = arith.index_cast %c10_i32 : i32 to index
    %155 = memref.load %arg1[%154] : memref<32xf32, #tpu.memory_space<smem>>
    %156 = vector.broadcast %155 : f32 to vector<8x128xf32>
    %157 = arith.mulf %2, %156 : vector<8x128xf32>
    %158 = arith.index_cast %c10_i32 : i32 to index
    %159 = memref.load %arg2[%158] : memref<32xf32, #tpu.memory_space<smem>>
    %160 = vector.broadcast %159 : f32 to vector<8x128xf32>
    %161 = arith.addf %157, %160 : vector<8x128xf32>
    %cst_14 = arith.constant 0.000000e+00 : f32
    %162 = vector.broadcast %cst_14 : f32 to vector<8x128xf32>
    %163 = arith.maximumf %161, %162 : vector<8x128xf32>
    %164 = arith.index_cast %c10_i32 : i32 to index
    %165 = memref.load %arg3[%164] : memref<32xf32, #tpu.memory_space<smem>>
    %166 = vector.broadcast %165 : f32 to vector<8x128xf32>
    %167 = arith.mulf %163, %166 : vector<8x128xf32>
    %168 = arith.addf %153, %167 : vector<8x128xf32>
    %c11_i32 = arith.constant 11 : i32
    %169 = arith.index_cast %c11_i32 : i32 to index
    %170 = memref.load %arg1[%169] : memref<32xf32, #tpu.memory_space<smem>>
    %171 = vector.broadcast %170 : f32 to vector<8x128xf32>
    %172 = arith.mulf %2, %171 : vector<8x128xf32>
    %173 = arith.index_cast %c11_i32 : i32 to index
    %174 = memref.load %arg2[%173] : memref<32xf32, #tpu.memory_space<smem>>
    %175 = vector.broadcast %174 : f32 to vector<8x128xf32>
    %176 = arith.addf %172, %175 : vector<8x128xf32>
    %cst_15 = arith.constant 0.000000e+00 : f32
    %177 = vector.broadcast %cst_15 : f32 to vector<8x128xf32>
    %178 = arith.maximumf %176, %177 : vector<8x128xf32>
    %179 = arith.index_cast %c11_i32 : i32 to index
    %180 = memref.load %arg3[%179] : memref<32xf32, #tpu.memory_space<smem>>
    %181 = vector.broadcast %180 : f32 to vector<8x128xf32>
    %182 = arith.mulf %178, %181 : vector<8x128xf32>
    %183 = arith.addf %168, %182 : vector<8x128xf32>
    %c12_i32 = arith.constant 12 : i32
    %184 = arith.index_cast %c12_i32 : i32 to index
    %185 = memref.load %arg1[%184] : memref<32xf32, #tpu.memory_space<smem>>
    %186 = vector.broadcast %185 : f32 to vector<8x128xf32>
    %187 = arith.mulf %2, %186 : vector<8x128xf32>
    %188 = arith.index_cast %c12_i32 : i32 to index
    %189 = memref.load %arg2[%188] : memref<32xf32, #tpu.memory_space<smem>>
    %190 = vector.broadcast %189 : f32 to vector<8x128xf32>
    %191 = arith.addf %187, %190 : vector<8x128xf32>
    %cst_16 = arith.constant 0.000000e+00 : f32
    %192 = vector.broadcast %cst_16 : f32 to vector<8x128xf32>
    %193 = arith.maximumf %191, %192 : vector<8x128xf32>
    %194 = arith.index_cast %c12_i32 : i32 to index
    %195 = memref.load %arg3[%194] : memref<32xf32, #tpu.memory_space<smem>>
    %196 = vector.broadcast %195 : f32 to vector<8x128xf32>
    %197 = arith.mulf %193, %196 : vector<8x128xf32>
    %198 = arith.addf %183, %197 : vector<8x128xf32>
    %c13_i32 = arith.constant 13 : i32
    %199 = arith.index_cast %c13_i32 : i32 to index
    %200 = memref.load %arg1[%199] : memref<32xf32, #tpu.memory_space<smem>>
    %201 = vector.broadcast %200 : f32 to vector<8x128xf32>
    %202 = arith.mulf %2, %201 : vector<8x128xf32>
    %203 = arith.index_cast %c13_i32 : i32 to index
    %204 = memref.load %arg2[%203] : memref<32xf32, #tpu.memory_space<smem>>
    %205 = vector.broadcast %204 : f32 to vector<8x128xf32>
    %206 = arith.addf %202, %205 : vector<8x128xf32>
    %cst_17 = arith.constant 0.000000e+00 : f32
    %207 = vector.broadcast %cst_17 : f32 to vector<8x128xf32>
    %208 = arith.maximumf %206, %207 : vector<8x128xf32>
    %209 = arith.index_cast %c13_i32 : i32 to index
    %210 = memref.load %arg3[%209] : memref<32xf32, #tpu.memory_space<smem>>
    %211 = vector.broadcast %210 : f32 to vector<8x128xf32>
    %212 = arith.mulf %208, %211 : vector<8x128xf32>
    %213 = arith.addf %198, %212 : vector<8x128xf32>
    %c14_i32 = arith.constant 14 : i32
    %214 = arith.index_cast %c14_i32 : i32 to index
    %215 = memref.load %arg1[%214] : memref<32xf32, #tpu.memory_space<smem>>
    %216 = vector.broadcast %215 : f32 to vector<8x128xf32>
    %217 = arith.mulf %2, %216 : vector<8x128xf32>
    %218 = arith.index_cast %c14_i32 : i32 to index
    %219 = memref.load %arg2[%218] : memref<32xf32, #tpu.memory_space<smem>>
    %220 = vector.broadcast %219 : f32 to vector<8x128xf32>
    %221 = arith.addf %217, %220 : vector<8x128xf32>
    %cst_18 = arith.constant 0.000000e+00 : f32
    %222 = vector.broadcast %cst_18 : f32 to vector<8x128xf32>
    %223 = arith.maximumf %221, %222 : vector<8x128xf32>
    %224 = arith.index_cast %c14_i32 : i32 to index
    %225 = memref.load %arg3[%224] : memref<32xf32, #tpu.memory_space<smem>>
    %226 = vector.broadcast %225 : f32 to vector<8x128xf32>
    %227 = arith.mulf %223, %226 : vector<8x128xf32>
    %228 = arith.addf %213, %227 : vector<8x128xf32>
    %c15_i32 = arith.constant 15 : i32
    %229 = arith.index_cast %c15_i32 : i32 to index
    %230 = memref.load %arg1[%229] : memref<32xf32, #tpu.memory_space<smem>>
    %231 = vector.broadcast %230 : f32 to vector<8x128xf32>
    %232 = arith.mulf %2, %231 : vector<8x128xf32>
    %233 = arith.index_cast %c15_i32 : i32 to index
    %234 = memref.load %arg2[%233] : memref<32xf32, #tpu.memory_space<smem>>
    %235 = vector.broadcast %234 : f32 to vector<8x128xf32>
    %236 = arith.addf %232, %235 : vector<8x128xf32>
    %cst_19 = arith.constant 0.000000e+00 : f32
    %237 = vector.broadcast %cst_19 : f32 to vector<8x128xf32>
    %238 = arith.maximumf %236, %237 : vector<8x128xf32>
    %239 = arith.index_cast %c15_i32 : i32 to index
    %240 = memref.load %arg3[%239] : memref<32xf32, #tpu.memory_space<smem>>
    %241 = vector.broadcast %240 : f32 to vector<8x128xf32>
    %242 = arith.mulf %238, %241 : vector<8x128xf32>
    %243 = arith.addf %228, %242 : vector<8x128xf32>
    %c16_i32 = arith.constant 16 : i32
    %244 = arith.index_cast %c16_i32 : i32 to index
    %245 = memref.load %arg1[%244] : memref<32xf32, #tpu.memory_space<smem>>
    %246 = vector.broadcast %245 : f32 to vector<8x128xf32>
    %247 = arith.mulf %2, %246 : vector<8x128xf32>
    %248 = arith.index_cast %c16_i32 : i32 to index
    %249 = memref.load %arg2[%248] : memref<32xf32, #tpu.memory_space<smem>>
    %250 = vector.broadcast %249 : f32 to vector<8x128xf32>
    %251 = arith.addf %247, %250 : vector<8x128xf32>
    %cst_20 = arith.constant 0.000000e+00 : f32
    %252 = vector.broadcast %cst_20 : f32 to vector<8x128xf32>
    %253 = arith.maximumf %251, %252 : vector<8x128xf32>
    %254 = arith.index_cast %c16_i32 : i32 to index
    %255 = memref.load %arg3[%254] : memref<32xf32, #tpu.memory_space<smem>>
    %256 = vector.broadcast %255 : f32 to vector<8x128xf32>
    %257 = arith.mulf %253, %256 : vector<8x128xf32>
    %258 = arith.addf %243, %257 : vector<8x128xf32>
    %c17_i32 = arith.constant 17 : i32
    %259 = arith.index_cast %c17_i32 : i32 to index
    %260 = memref.load %arg1[%259] : memref<32xf32, #tpu.memory_space<smem>>
    %261 = vector.broadcast %260 : f32 to vector<8x128xf32>
    %262 = arith.mulf %2, %261 : vector<8x128xf32>
    %263 = arith.index_cast %c17_i32 : i32 to index
    %264 = memref.load %arg2[%263] : memref<32xf32, #tpu.memory_space<smem>>
    %265 = vector.broadcast %264 : f32 to vector<8x128xf32>
    %266 = arith.addf %262, %265 : vector<8x128xf32>
    %cst_21 = arith.constant 0.000000e+00 : f32
    %267 = vector.broadcast %cst_21 : f32 to vector<8x128xf32>
    %268 = arith.maximumf %266, %267 : vector<8x128xf32>
    %269 = arith.index_cast %c17_i32 : i32 to index
    %270 = memref.load %arg3[%269] : memref<32xf32, #tpu.memory_space<smem>>
    %271 = vector.broadcast %270 : f32 to vector<8x128xf32>
    %272 = arith.mulf %268, %271 : vector<8x128xf32>
    %273 = arith.addf %258, %272 : vector<8x128xf32>
    %c18_i32 = arith.constant 18 : i32
    %274 = arith.index_cast %c18_i32 : i32 to index
    %275 = memref.load %arg1[%274] : memref<32xf32, #tpu.memory_space<smem>>
    %276 = vector.broadcast %275 : f32 to vector<8x128xf32>
    %277 = arith.mulf %2, %276 : vector<8x128xf32>
    %278 = arith.index_cast %c18_i32 : i32 to index
    %279 = memref.load %arg2[%278] : memref<32xf32, #tpu.memory_space<smem>>
    %280 = vector.broadcast %279 : f32 to vector<8x128xf32>
    %281 = arith.addf %277, %280 : vector<8x128xf32>
    %cst_22 = arith.constant 0.000000e+00 : f32
    %282 = vector.broadcast %cst_22 : f32 to vector<8x128xf32>
    %283 = arith.maximumf %281, %282 : vector<8x128xf32>
    %284 = arith.index_cast %c18_i32 : i32 to index
    %285 = memref.load %arg3[%284] : memref<32xf32, #tpu.memory_space<smem>>
    %286 = vector.broadcast %285 : f32 to vector<8x128xf32>
    %287 = arith.mulf %283, %286 : vector<8x128xf32>
    %288 = arith.addf %273, %287 : vector<8x128xf32>
    %c19_i32 = arith.constant 19 : i32
    %289 = arith.index_cast %c19_i32 : i32 to index
    %290 = memref.load %arg1[%289] : memref<32xf32, #tpu.memory_space<smem>>
    %291 = vector.broadcast %290 : f32 to vector<8x128xf32>
    %292 = arith.mulf %2, %291 : vector<8x128xf32>
    %293 = arith.index_cast %c19_i32 : i32 to index
    %294 = memref.load %arg2[%293] : memref<32xf32, #tpu.memory_space<smem>>
    %295 = vector.broadcast %294 : f32 to vector<8x128xf32>
    %296 = arith.addf %292, %295 : vector<8x128xf32>
    %cst_23 = arith.constant 0.000000e+00 : f32
    %297 = vector.broadcast %cst_23 : f32 to vector<8x128xf32>
    %298 = arith.maximumf %296, %297 : vector<8x128xf32>
    %299 = arith.index_cast %c19_i32 : i32 to index
    %300 = memref.load %arg3[%299] : memref<32xf32, #tpu.memory_space<smem>>
    %301 = vector.broadcast %300 : f32 to vector<8x128xf32>
    %302 = arith.mulf %298, %301 : vector<8x128xf32>
    %303 = arith.addf %288, %302 : vector<8x128xf32>
    %c20_i32 = arith.constant 20 : i32
    %304 = arith.index_cast %c20_i32 : i32 to index
    %305 = memref.load %arg1[%304] : memref<32xf32, #tpu.memory_space<smem>>
    %306 = vector.broadcast %305 : f32 to vector<8x128xf32>
    %307 = arith.mulf %2, %306 : vector<8x128xf32>
    %308 = arith.index_cast %c20_i32 : i32 to index
    %309 = memref.load %arg2[%308] : memref<32xf32, #tpu.memory_space<smem>>
    %310 = vector.broadcast %309 : f32 to vector<8x128xf32>
    %311 = arith.addf %307, %310 : vector<8x128xf32>
    %cst_24 = arith.constant 0.000000e+00 : f32
    %312 = vector.broadcast %cst_24 : f32 to vector<8x128xf32>
    %313 = arith.maximumf %311, %312 : vector<8x128xf32>
    %314 = arith.index_cast %c20_i32 : i32 to index
    %315 = memref.load %arg3[%314] : memref<32xf32, #tpu.memory_space<smem>>
    %316 = vector.broadcast %315 : f32 to vector<8x128xf32>
    %317 = arith.mulf %313, %316 : vector<8x128xf32>
    %318 = arith.addf %303, %317 : vector<8x128xf32>
    %c21_i32 = arith.constant 21 : i32
    %319 = arith.index_cast %c21_i32 : i32 to index
    %320 = memref.load %arg1[%319] : memref<32xf32, #tpu.memory_space<smem>>
    %321 = vector.broadcast %320 : f32 to vector<8x128xf32>
    %322 = arith.mulf %2, %321 : vector<8x128xf32>
    %323 = arith.index_cast %c21_i32 : i32 to index
    %324 = memref.load %arg2[%323] : memref<32xf32, #tpu.memory_space<smem>>
    %325 = vector.broadcast %324 : f32 to vector<8x128xf32>
    %326 = arith.addf %322, %325 : vector<8x128xf32>
    %cst_25 = arith.constant 0.000000e+00 : f32
    %327 = vector.broadcast %cst_25 : f32 to vector<8x128xf32>
    %328 = arith.maximumf %326, %327 : vector<8x128xf32>
    %329 = arith.index_cast %c21_i32 : i32 to index
    %330 = memref.load %arg3[%329] : memref<32xf32, #tpu.memory_space<smem>>
    %331 = vector.broadcast %330 : f32 to vector<8x128xf32>
    %332 = arith.mulf %328, %331 : vector<8x128xf32>
    %333 = arith.addf %318, %332 : vector<8x128xf32>
    %c22_i32 = arith.constant 22 : i32
    %334 = arith.index_cast %c22_i32 : i32 to index
    %335 = memref.load %arg1[%334] : memref<32xf32, #tpu.memory_space<smem>>
    %336 = vector.broadcast %335 : f32 to vector<8x128xf32>
    %337 = arith.mulf %2, %336 : vector<8x128xf32>
    %338 = arith.index_cast %c22_i32 : i32 to index
    %339 = memref.load %arg2[%338] : memref<32xf32, #tpu.memory_space<smem>>
    %340 = vector.broadcast %339 : f32 to vector<8x128xf32>
    %341 = arith.addf %337, %340 : vector<8x128xf32>
    %cst_26 = arith.constant 0.000000e+00 : f32
    %342 = vector.broadcast %cst_26 : f32 to vector<8x128xf32>
    %343 = arith.maximumf %341, %342 : vector<8x128xf32>
    %344 = arith.index_cast %c22_i32 : i32 to index
    %345 = memref.load %arg3[%344] : memref<32xf32, #tpu.memory_space<smem>>
    %346 = vector.broadcast %345 : f32 to vector<8x128xf32>
    %347 = arith.mulf %343, %346 : vector<8x128xf32>
    %348 = arith.addf %333, %347 : vector<8x128xf32>
    %c23_i32 = arith.constant 23 : i32
    %349 = arith.index_cast %c23_i32 : i32 to index
    %350 = memref.load %arg1[%349] : memref<32xf32, #tpu.memory_space<smem>>
    %351 = vector.broadcast %350 : f32 to vector<8x128xf32>
    %352 = arith.mulf %2, %351 : vector<8x128xf32>
    %353 = arith.index_cast %c23_i32 : i32 to index
    %354 = memref.load %arg2[%353] : memref<32xf32, #tpu.memory_space<smem>>
    %355 = vector.broadcast %354 : f32 to vector<8x128xf32>
    %356 = arith.addf %352, %355 : vector<8x128xf32>
    %cst_27 = arith.constant 0.000000e+00 : f32
    %357 = vector.broadcast %cst_27 : f32 to vector<8x128xf32>
    %358 = arith.maximumf %356, %357 : vector<8x128xf32>
    %359 = arith.index_cast %c23_i32 : i32 to index
    %360 = memref.load %arg3[%359] : memref<32xf32, #tpu.memory_space<smem>>
    %361 = vector.broadcast %360 : f32 to vector<8x128xf32>
    %362 = arith.mulf %358, %361 : vector<8x128xf32>
    %363 = arith.addf %348, %362 : vector<8x128xf32>
    %c24_i32 = arith.constant 24 : i32
    %364 = arith.index_cast %c24_i32 : i32 to index
    %365 = memref.load %arg1[%364] : memref<32xf32, #tpu.memory_space<smem>>
    %366 = vector.broadcast %365 : f32 to vector<8x128xf32>
    %367 = arith.mulf %2, %366 : vector<8x128xf32>
    %368 = arith.index_cast %c24_i32 : i32 to index
    %369 = memref.load %arg2[%368] : memref<32xf32, #tpu.memory_space<smem>>
    %370 = vector.broadcast %369 : f32 to vector<8x128xf32>
    %371 = arith.addf %367, %370 : vector<8x128xf32>
    %cst_28 = arith.constant 0.000000e+00 : f32
    %372 = vector.broadcast %cst_28 : f32 to vector<8x128xf32>
    %373 = arith.maximumf %371, %372 : vector<8x128xf32>
    %374 = arith.index_cast %c24_i32 : i32 to index
    %375 = memref.load %arg3[%374] : memref<32xf32, #tpu.memory_space<smem>>
    %376 = vector.broadcast %375 : f32 to vector<8x128xf32>
    %377 = arith.mulf %373, %376 : vector<8x128xf32>
    %378 = arith.addf %363, %377 : vector<8x128xf32>
    %c25_i32 = arith.constant 25 : i32
    %379 = arith.index_cast %c25_i32 : i32 to index
    %380 = memref.load %arg1[%379] : memref<32xf32, #tpu.memory_space<smem>>
    %381 = vector.broadcast %380 : f32 to vector<8x128xf32>
    %382 = arith.mulf %2, %381 : vector<8x128xf32>
    %383 = arith.index_cast %c25_i32 : i32 to index
    %384 = memref.load %arg2[%383] : memref<32xf32, #tpu.memory_space<smem>>
    %385 = vector.broadcast %384 : f32 to vector<8x128xf32>
    %386 = arith.addf %382, %385 : vector<8x128xf32>
    %cst_29 = arith.constant 0.000000e+00 : f32
    %387 = vector.broadcast %cst_29 : f32 to vector<8x128xf32>
    %388 = arith.maximumf %386, %387 : vector<8x128xf32>
    %389 = arith.index_cast %c25_i32 : i32 to index
    %390 = memref.load %arg3[%389] : memref<32xf32, #tpu.memory_space<smem>>
    %391 = vector.broadcast %390 : f32 to vector<8x128xf32>
    %392 = arith.mulf %388, %391 : vector<8x128xf32>
    %393 = arith.addf %378, %392 : vector<8x128xf32>
    %c26_i32 = arith.constant 26 : i32
    %394 = arith.index_cast %c26_i32 : i32 to index
    %395 = memref.load %arg1[%394] : memref<32xf32, #tpu.memory_space<smem>>
    %396 = vector.broadcast %395 : f32 to vector<8x128xf32>
    %397 = arith.mulf %2, %396 : vector<8x128xf32>
    %398 = arith.index_cast %c26_i32 : i32 to index
    %399 = memref.load %arg2[%398] : memref<32xf32, #tpu.memory_space<smem>>
    %400 = vector.broadcast %399 : f32 to vector<8x128xf32>
    %401 = arith.addf %397, %400 : vector<8x128xf32>
    %cst_30 = arith.constant 0.000000e+00 : f32
    %402 = vector.broadcast %cst_30 : f32 to vector<8x128xf32>
    %403 = arith.maximumf %401, %402 : vector<8x128xf32>
    %404 = arith.index_cast %c26_i32 : i32 to index
    %405 = memref.load %arg3[%404] : memref<32xf32, #tpu.memory_space<smem>>
    %406 = vector.broadcast %405 : f32 to vector<8x128xf32>
    %407 = arith.mulf %403, %406 : vector<8x128xf32>
    %408 = arith.addf %393, %407 : vector<8x128xf32>
    %c27_i32 = arith.constant 27 : i32
    %409 = arith.index_cast %c27_i32 : i32 to index
    %410 = memref.load %arg1[%409] : memref<32xf32, #tpu.memory_space<smem>>
    %411 = vector.broadcast %410 : f32 to vector<8x128xf32>
    %412 = arith.mulf %2, %411 : vector<8x128xf32>
    %413 = arith.index_cast %c27_i32 : i32 to index
    %414 = memref.load %arg2[%413] : memref<32xf32, #tpu.memory_space<smem>>
    %415 = vector.broadcast %414 : f32 to vector<8x128xf32>
    %416 = arith.addf %412, %415 : vector<8x128xf32>
    %cst_31 = arith.constant 0.000000e+00 : f32
    %417 = vector.broadcast %cst_31 : f32 to vector<8x128xf32>
    %418 = arith.maximumf %416, %417 : vector<8x128xf32>
    %419 = arith.index_cast %c27_i32 : i32 to index
    %420 = memref.load %arg3[%419] : memref<32xf32, #tpu.memory_space<smem>>
    %421 = vector.broadcast %420 : f32 to vector<8x128xf32>
    %422 = arith.mulf %418, %421 : vector<8x128xf32>
    %423 = arith.addf %408, %422 : vector<8x128xf32>
    %c28_i32 = arith.constant 28 : i32
    %424 = arith.index_cast %c28_i32 : i32 to index
    %425 = memref.load %arg1[%424] : memref<32xf32, #tpu.memory_space<smem>>
    %426 = vector.broadcast %425 : f32 to vector<8x128xf32>
    %427 = arith.mulf %2, %426 : vector<8x128xf32>
    %428 = arith.index_cast %c28_i32 : i32 to index
    %429 = memref.load %arg2[%428] : memref<32xf32, #tpu.memory_space<smem>>
    %430 = vector.broadcast %429 : f32 to vector<8x128xf32>
    %431 = arith.addf %427, %430 : vector<8x128xf32>
    %cst_32 = arith.constant 0.000000e+00 : f32
    %432 = vector.broadcast %cst_32 : f32 to vector<8x128xf32>
    %433 = arith.maximumf %431, %432 : vector<8x128xf32>
    %434 = arith.index_cast %c28_i32 : i32 to index
    %435 = memref.load %arg3[%434] : memref<32xf32, #tpu.memory_space<smem>>
    %436 = vector.broadcast %435 : f32 to vector<8x128xf32>
    %437 = arith.mulf %433, %436 : vector<8x128xf32>
    %438 = arith.addf %423, %437 : vector<8x128xf32>
    %c29_i32 = arith.constant 29 : i32
    %439 = arith.index_cast %c29_i32 : i32 to index
    %440 = memref.load %arg1[%439] : memref<32xf32, #tpu.memory_space<smem>>
    %441 = vector.broadcast %440 : f32 to vector<8x128xf32>
    %442 = arith.mulf %2, %441 : vector<8x128xf32>
    %443 = arith.index_cast %c29_i32 : i32 to index
    %444 = memref.load %arg2[%443] : memref<32xf32, #tpu.memory_space<smem>>
    %445 = vector.broadcast %444 : f32 to vector<8x128xf32>
    %446 = arith.addf %442, %445 : vector<8x128xf32>
    %cst_33 = arith.constant 0.000000e+00 : f32
    %447 = vector.broadcast %cst_33 : f32 to vector<8x128xf32>
    %448 = arith.maximumf %446, %447 : vector<8x128xf32>
    %449 = arith.index_cast %c29_i32 : i32 to index
    %450 = memref.load %arg3[%449] : memref<32xf32, #tpu.memory_space<smem>>
    %451 = vector.broadcast %450 : f32 to vector<8x128xf32>
    %452 = arith.mulf %448, %451 : vector<8x128xf32>
    %453 = arith.addf %438, %452 : vector<8x128xf32>
    %c30_i32 = arith.constant 30 : i32
    %454 = arith.index_cast %c30_i32 : i32 to index
    %455 = memref.load %arg1[%454] : memref<32xf32, #tpu.memory_space<smem>>
    %456 = vector.broadcast %455 : f32 to vector<8x128xf32>
    %457 = arith.mulf %2, %456 : vector<8x128xf32>
    %458 = arith.index_cast %c30_i32 : i32 to index
    %459 = memref.load %arg2[%458] : memref<32xf32, #tpu.memory_space<smem>>
    %460 = vector.broadcast %459 : f32 to vector<8x128xf32>
    %461 = arith.addf %457, %460 : vector<8x128xf32>
    %cst_34 = arith.constant 0.000000e+00 : f32
    %462 = vector.broadcast %cst_34 : f32 to vector<8x128xf32>
    %463 = arith.maximumf %461, %462 : vector<8x128xf32>
    %464 = arith.index_cast %c30_i32 : i32 to index
    %465 = memref.load %arg3[%464] : memref<32xf32, #tpu.memory_space<smem>>
    %466 = vector.broadcast %465 : f32 to vector<8x128xf32>
    %467 = arith.mulf %463, %466 : vector<8x128xf32>
    %468 = arith.addf %453, %467 : vector<8x128xf32>
    %c31_i32 = arith.constant 31 : i32
    %469 = arith.index_cast %c31_i32 : i32 to index
    %470 = memref.load %arg1[%469] : memref<32xf32, #tpu.memory_space<smem>>
    %471 = vector.broadcast %470 : f32 to vector<8x128xf32>
    %472 = arith.mulf %2, %471 : vector<8x128xf32>
    %473 = arith.index_cast %c31_i32 : i32 to index
    %474 = memref.load %arg2[%473] : memref<32xf32, #tpu.memory_space<smem>>
    %475 = vector.broadcast %474 : f32 to vector<8x128xf32>
    %476 = arith.addf %472, %475 : vector<8x128xf32>
    %cst_35 = arith.constant 0.000000e+00 : f32
    %477 = vector.broadcast %cst_35 : f32 to vector<8x128xf32>
    %478 = arith.maximumf %476, %477 : vector<8x128xf32>
    %479 = arith.index_cast %c31_i32 : i32 to index
    %480 = memref.load %arg3[%479] : memref<32xf32, #tpu.memory_space<smem>>
    %481 = vector.broadcast %480 : f32 to vector<8x128xf32>
    %482 = arith.mulf %478, %481 : vector<8x128xf32>
    %483 = arith.addf %468, %482 : vector<8x128xf32>
    %c32_i32 = arith.constant 32 : i32
    %484 = arith.truncf %483 : vector<8x128xf32> to vector<8x128xbf16>
    %cst_36 = arith.constant dense<0.000000e+00> : vector<8x128xf32>
    %485 = tpu.matmul %484, %1, %cst_36 {dimension_numbers = #tpu.dot_dimension_numbers<[1], [0], [0], [1], [0, 0, 1, 1], [], []>} : vector<8x128xbf16>, vector<128x128xbf16>, vector<8x128xf32> -> vector<8x128xf32>
    %c0_37 = arith.constant 0 : index
    %486 = memref.load %arg4[%c0_37] : memref<1xf32, #tpu.memory_space<smem>>
    %487 = vector.broadcast %486 : f32 to vector<8x128xf32>
    %488 = arith.addf %485, %487 : vector<8x128xf32>
    %489 = arith.truncf %488 : vector<8x128xf32> to vector<8x128xbf16>
    %c0_38 = arith.constant 0 : index
    %c0_39 = arith.constant 0 : index
    %490 = vector.load %arg7[%c0_38, %c0_39] : memref<128x32xbf16, #tpu.memory_space<vmem>>, vector<128x32xbf16>
    %cst_40 = arith.constant dense<0.000000e+00> : vector<8x32xf32>
    %491 = tpu.matmul %489, %490, %cst_40 {dimension_numbers = #tpu.dot_dimension_numbers<[1], [0], [0], [1], [0, 0, 1, 1], [], []>} : vector<8x128xbf16>, vector<128x32xbf16>, vector<8x32xf32> -> vector<8x32xf32>
    %c0_41 = arith.constant 0 : index
    %c0_42 = arith.constant 0 : index
    %492 = vector.load %arg8[%c0_41, %c0_42] : memref<1x32xf32, #tpu.memory_space<vmem>>, vector<1x32xf32>
    %493 = vector.broadcast %492 : vector<1x32xf32> to vector<8x32xf32>
    %494 = arith.addf %491, %493 : vector<8x32xf32>
    %cst_43 = arith.constant 0.000000e+00 : f32
    %495 = vector.broadcast %cst_43 : f32 to vector<8x32xf32>
    %496 = arith.maximumf %494, %495 : vector<8x32xf32>
    %497 = arith.truncf %496 : vector<8x32xf32> to vector<8x32xbf16>
    %c0_44 = arith.constant 0 : index
    %c0_45 = arith.constant 0 : index
    %498 = vector.load %arg9[%c0_44, %c0_45] : memref<32x8xbf16, #tpu.memory_space<vmem>>, vector<32x8xbf16>
    %cst_46 = arith.constant dense<0.000000e+00> : vector<8x8xf32>
    %499 = tpu.matmul %497, %498, %cst_46 {dimension_numbers = #tpu.dot_dimension_numbers<[1], [0], [0], [1], [0, 0, 1, 1], [], []>} : vector<8x32xbf16>, vector<32x8xbf16>, vector<8x8xf32> -> vector<8x8xf32>
    %c0_47 = arith.constant 0 : index
    %c0_48 = arith.constant 0 : index
    %500 = vector.load %arg10[%c0_47, %c0_48] : memref<1x8xf32, #tpu.memory_space<vmem>>, vector<1x8xf32>
    %501 = vector.broadcast %500 : vector<1x8xf32> to vector<8x8xf32>
    %502 = arith.addf %499, %501 : vector<8x8xf32>
    %503 = arith.negf %502 : vector<8x8xf32>
    %504 = math.exp %503 : vector<8x8xf32>
    %cst_49 = arith.constant 1.000000e+00 : f32
    %505 = vector.broadcast %cst_49 : f32 to vector<8x8xf32>
    %506 = arith.addf %505, %504 : vector<8x8xf32>
    %507 = arith.divf %505, %506 : vector<8x8xf32>
    %c0_50 = arith.constant 0 : index
    %c0_51 = arith.constant 0 : index
    %508 = vector.load %arg11[%c0_50, %c0_51] : memref<8x8xf32, #tpu.memory_space<vmem>>, vector<8x8xf32>
    tpu.vector_store %arg11[%c0_50, %c0_51], %507 {strides = array<i32>} : memref<8x8xf32, #tpu.memory_space<vmem>>, vector<8x8xf32>,
    return
  }
  func.func @transform_0(%arg0: i32) -> i32 {
    %c0_i32 = arith.constant 0 : i32
    %c0_i32_0 = arith.constant 0 : i32
    return %c0_i32 : i32
  }
  func.func @transform_1(%arg0: i32) -> i32 {
    %c0_i32 = arith.constant 0 : i32
    %c0_i32_0 = arith.constant 0 : i32
    return %c0_i32 : i32
  }
  func.func @transform_2(%arg0: i32) -> i32 {
    %c0_i32 = arith.constant 0 : i32
    %c0_i32_0 = arith.constant 0 : i32
    return %c0_i32 : i32
  }
  func.func @transform_3(%arg0: i32) -> i32 {
    %c0_i32 = arith.constant 0 : i32
    %c0_i32_0 = arith.constant 0 : i32
    return %c0_i32 : i32
  }
  func.func @transform_4(%arg0: i32) -> (i32, i32) {
    %c0_i32 = arith.constant 0 : i32
    %c0_i32_0 = arith.constant 0 : i32
    return %arg0, %c0_i32 : i32, i32
  }
  func.func @transform_5(%arg0: i32) -> (i32, i32) {
    %c0_i32 = arith.constant 0 : i32
    %c0_i32_0 = arith.constant 0 : i32
    %c0_i32_1 = arith.constant 0 : i32
    return %c0_i32, %c0_i32_0 : i32, i32
  }
  func.func @transform_6(%arg0: i32) -> (i32, i32) {
    %c0_i32 = arith.constant 0 : i32
    %c0_i32_0 = arith.constant 0 : i32
    %c0_i32_1 = arith.constant 0 : i32
    return %c0_i32, %c0_i32_0 : i32, i32
  }
  func.func @transform_7(%arg0: i32) -> (i32, i32) {
    %c0_i32 = arith.constant 0 : i32
    %c0_i32_0 = arith.constant 0 : i32
    %c0_i32_1 = arith.constant 0 : i32
    return %c0_i32, %c0_i32_0 : i32, i32
  }
  func.func @transform_8(%arg0: i32) -> (i32, i32) {
    %c0_i32 = arith.constant 0 : i32
    %c0_i32_0 = arith.constant 0 : i32
    %c0_i32_1 = arith.constant 0 : i32
    return %c0_i32, %c0_i32_0 : i32, i32
  }
  func.func @transform_9(%arg0: i32) -> (i32, i32) {
    %c0_i32 = arith.constant 0 : i32
    %c0_i32_0 = arith.constant 0 : i32
    %c0_i32_1 = arith.constant 0 : i32
    return %c0_i32, %c0_i32_0 : i32, i32
  }
  func.func @transform_10(%arg0: i32) -> (i32, i32) {
    %c0_i32 = arith.constant 0 : i32
    %c0_i32_0 = arith.constant 0 : i32
    return %arg0, %c0_i32 : i32, i32
  }
}

</mosaic_0001>

<bundles_post_ra>
// kernel: tpu_custom_call.1
= control target key start
LH: loop header
LB: loop body
LE: loop exit
PB: predicated region body
PF: predicated region fallthrough
CT: control target
= control target key end

     0   :  { %s1867_s0 = inlined_call_operand.vmem [shape: f32[32], index: 0, kind: input, shape index: {}]   ;;  %s1868_s1 = inlined_call_operand.vmem [shape: f32[32], index: 1, kind: input, shape index: {}]   ;;  %s1869_s2 = inlined_call_operand.vmem [shape: f32[32], index: 2, kind: input, shape index: {}]   ;;  %s1870_s3 = inlined_call_operand.<no memory space> [shape: f32[1], index: 3, kind: input, shape index: {}]   ;;  %s1871_s4 = inlined_call_operand.vmem [shape: bf16[16,128], index: 4, kind: input, shape index: {}]   ;;  %s1872_s5 = inlined_call_operand.vmem [shape: bf16[128,128], index: 5, kind: input, shape index: {}]   ;;  %s1873_s6 = inlined_call_operand.vmem [shape: bf16[128,32], index: 6, kind: input, shape index: {}]   ;;  %s1874_s7 = inlined_call_operand.vmem [shape: f32[1,32], index: 7, kind: input, shape index: {}]   ;;  %s1875_s8 = inlined_call_operand.vmem [shape: bf16[32,8], index: 8, kind: input, shape index: {}]   ;;  %s1876_s9 = inlined_call_operand.vmem [shape: f32[1,8], index: 9, kind: input, shape index: {}]   ;;  %s1877_s10 = inlined_call_operand.vmem [shape: f32[16,8], index: 10, kind: output, shape index: {}]  }
   0x1   :  { %1882 = sst [smem:[#allocation24_spill]] %s1867_s0 }
   0x2   :  { %1883 = sst [smem:[#allocation25_spill]] %s1868_s1 }
   0x3   :  { %1884 = sst [smem:[#allocation26_spill]] %s1869_s2 }
   0x4   :  { %1885 = sst [smem:[#allocation27_spill]] %s1871_s4 }
   0x5   :  { %1886 = sst [smem:[#allocation28_spill]] %s1872_s5 }
   0x6   :  { %1887 = sst [smem:[#allocation29_spill]] %s1873_s6 }
   0x7   :  { %1888 = sst [smem:[#allocation30_spill]] %s1874_s7 }
   0x8   :  { %1889 = sst [smem:[#allocation31_spill]] %s1875_s8 }
   0x9   :  { %1890 = sst [smem:[#allocation32_spill]] %s1876_s9 }
   0xa   :  { %1891 = sst [smem:[#allocation33_spill]] %s1877_s10 }
   0xb   :  { %15 = sst [smem:[#allocation2]] %s1870_s3 }
   0xc   :  { %16 = vsyncpa [#allocation4], 0 }
   0xd   :  { %17 = vsyncpa [#allocation6], 0  ;;  %s1435_s15 = smov 0  }
   0xe LB: > { %1892 = sst [smem:[#allocation10_spill]] %s1372_s15  ;;  %s1441_s16 = sadd.s32 4294967295, %s1372_s15   ;;  %s1372_s15 = sphi %s1435_s15, %s23_s15  }
   0xf   : > { %p1070_p0 = scmp.ge.s32.totalorder %s1372_s15, 1  ;;  %p269_p1 = scmp.lt.s32.totalorder %s1372_s15, 3 }
  0x10   : > { %s1893_s1 = sld [smem:[#allocation25_spill]]  ;;  %p1290_p3 = scmp.eq.s32.totalorder %s1441_s16, 0 }
  0x11   : > { %p1448_p2 = pnand %p1070_p0, %p269_p1  ;;  %s1895_s0 = sld [smem:[#allocation24_spill]] }
  0x12   : > { %s1896_s2 = sld [smem:[#allocation26_spill]]  ;;  %s1374_s26 = smov [#allocation5]  }
  0x13   : > { %p1280_p4 = pneg %p1448_p2  ;;  %s1375_s27 = smov [#allocation3]  }
  0x14   : > { %s1376_s28 = smov [#allocation7]  }
  0x15   : > { %p1281_p5 = pnand %p1290_p3, %p1280_p4 }
  0x16   : > { %s291_s18 = sshll.u32 %s1893_s1, 4  ;;  %s292_s18 = int_to_ptr.vmem [resolvable:$true] %s291_s18 }
  0x17   : > { %s281_s22 = sshll.u32 %s1895_s0, 4  ;;  %339 = sbr.rel (%p1448_p2) target bundleno = 700 (0x2bc), region = 60  ;;  %s282_s22 = int_to_ptr.vmem [resolvable:$true] %s281_s22 }
  0x18   : > { %s301_s25 = sshll.u32 %s1896_s2, 4  ;;  %s302_s25 = int_to_ptr.vmem [resolvable:$true] %s301_s25 }
  0x19   : > { %1286 = dma.vmem_to_smem (!%p1281_p5), %s292_s18, 16, %s1374_s26, [#allocation6]  }
  0x1a   : > { %1283 = dma.vmem_to_smem (!%p1281_p5), %s282_s22, 16, %s1375_s27, [#allocation4]  }
  0x1b   : > { %1289 = dma.vmem_to_smem (!%p1281_p5), %s302_s25, 16, %s1376_s28, [#allocation6]  }
  0x1c   : > { %1363 = dma.done.wait (%p1290_p3), [#allocation4], 16  }
  0x1d   : > { %1365 = vsyncadd (%p1290_p3), [#allocation4], 4294967280 }
  0x1e   : > { %1367 = dma.done.wait (%p1290_p3), [#allocation6], 32  }
  0x1f   : > { %1369 = vsyncadd (%p1290_p3), [#allocation6], 4294967264 }
  0x20   : > { %356 = sfence }
  0x21   : > { %s1897_s5 = sld [smem:[#allocation28_spill]]  ;;  %p387_p6 = scmp.lt.s32.totalorder %s1441_s16, 1  ;;  %vm946_vm0 = vcmask 261120   ;;  %vm982_vm4 = vcmask 64512  }
  0x22   : > { %s1899_s4 = sld [smem:[#allocation27_spill]] }
  0x23   : > { %s1932_s16 = smov (!%p387_p6, %s1441_s16), 1  ;;  %s1505_s30 = sld [smem:[#allocation3]] }
  0x24   : > { %1898 = sst [smem:[#allocation11_spill]] %s1932_s16  ;;  %s1079_s24 = sshll.u32 %s1932_s16, 2 }
  0x25   : > { %s1507_s11 = sld [smem:[#allocation3 + $0x1]] }
  0x26   : > { %s1509_s12 = sld [smem:[#allocation5]] }
  0x27   : > { %v1257_v0 = vld [vmem:[%s1897_s5 + $0x38] sm:$0xff]  ;;  %v1256_v1 = vld [vmem:[%s1897_s5 + $0x30] sm:$0xff]  ;;  %v1255_v2 = vld [vmem:[%s1897_s5 + $0x28] sm:$0xff]  ;;  %s1511_s13 = sld [smem:[#allocation5 + $0x1]] }
  0x28   : > { %461 = vmatpush.bf16.msra.mxu0 %v1257_v0  ;;  %829 = vmatpush.bf16.msra.mxu1 %v1257_v0  ;;  %v1254_v3 = vld [vmem:[%s1897_s5 + $0x20] sm:$0xff]  ;;  %v1253_v4 = vld [vmem:[%s1897_s5 + $0x18] sm:$0xff]  ;;  %v1252_v5 = vld [vmem:[%s1897_s5 + $0x10] sm:$0xff]  ;;  %s390_s29 = scalar_lea.vmem %s1899_s4, %s1079_s24  ;;  %s1513_s14 = sld [smem:[#allocation3 + $0x2]] }
  0x29   : > { %v1251_v6 = vld [vmem:[%s1897_s5 + $0x8] sm:$0xff]  ;;  %v1250_v7 = vld [vmem:[%s1897_s5] sm:$0xff]  ;;  %s1515_s17 = sld [smem:[#allocation5 + $0x2]]  ;;  %v475_v9 = vstv %s1505_s30 }
  0x2a   : > { %v396_v8 = vld [vmem:[%s390_s29] sm:$0xf]  ;;  %s1517_s3 = sld [smem:[#allocation7]] }
  0x2b   : > { %s1519_s18 = sld [smem:[#allocation7 + $0x1]]  ;;  %v486_v10 = vstv %s1507_s11 }
  0x2c   : > { %462 = vmatpush.bf16.msra.mxu0 %v1256_v1  ;;  %830 = vmatpush.bf16.msra.mxu1 %v1256_v1  ;;  %s1521_s19 = sld [smem:[#allocation7 + $0x2]]  ;;  %v478_v18 = vstv %s1509_s12 }
  0x2d   : > { %s1523_s20 = sld [smem:[#allocation3 + $0x3]]  ;;  %v489_v19 = vstv %s1511_s13 }
  0x2e   : > { %s1525_s21 = sld [smem:[#allocation5 + $0x3]]  ;;  %v497_v11 = vstv %s1513_s14 }
  0x2f   : > { %s1527_s22 = sld [smem:[#allocation7 + $0x3]]  ;;  %v500_v20 = vstv %s1515_s17 }
  0x30   : > { %463 = vmatpush.bf16.msra.mxu0 %v1255_v2  ;;  %831 = vmatpush.bf16.msra.mxu1 %v1255_v2  ;;  %s1529_s23 = sld [smem:[#allocation3 + $0x4]]  ;;  %v482_v34 = vstv %s1517_s3 }
  0x31   : > { %s1531_s24 = sld [smem:[#allocation5 + $0x4]]  ;;  %v493_v35 = vstv %s1519_s18 }
  0x32   : > { %s1533_s25 = sld [smem:[#allocation7 + $0x4]]  ;;  %v504_v42 = vstv %s1521_s19 }
  0x33   : > { %s1535_s26 = sld [smem:[#allocation3 + $0x5]]  ;;  %v508_v12 = vstv %s1523_s20 }
  0x34   : > { %464 = vmatpush.bf16.msra.mxu0 %v1254_v3  ;;  %832 = vmatpush.bf16.msra.mxu1 %v1254_v3  ;;  %s1537_s27 = sld [smem:[#allocation5 + $0x5]]  ;;  %v511_v21 = vstv %s1525_s21 }
  0x35   : > { %s1539_s28 = sld [smem:[#allocation7 + $0x5]]  ;;  %v515_v51 = vstv %s1527_s22 }
  0x36   : > { %s1541_s29 = sld [smem:[#allocation3 + $0x6]]  ;;  %v519_v13 = vstv %s1529_s23 }
  0x37   : > { %s1543_s0 = sld [smem:[#allocation5 + $0x6]]  ;;  %v522_v27 = vstv %s1531_s24 }
  0x38   : > { %465 = vmatpush.bf16.msra.mxu0 %v1253_v4  ;;  %833 = vmatpush.bf16.msra.mxu1 %v1253_v4  ;;  %s1545_s1 = sld [smem:[#allocation7 + $0x6]]  ;;  %v526_v52 = vstv %s1533_s25 }
  0x39   : > { %s1547_s2 = sld [smem:[#allocation3 + $0x7]]  ;;  %v530_v14 = vstv %s1535_s26 }
  0x3a   : > { %s1549_s4 = sld [smem:[#allocation5 + $0x7]]  ;;  %v533_v29 = vstv %s1537_s27 }
  0x3b   : > { %1900 = sst [smem:[#allocation12_spill]] %s1539_s28 }
  0x3c   : > { %466 = vmatpush.bf16.msra.mxu0 %v1252_v5  ;;  %834 = vmatpush.bf16.msra.mxu1 %v1252_v5  ;;  %s1551_s5 = sld [smem:[#allocation7 + $0x7]]  ;;  %v541_v15 = vstv %s1541_s29 }
  0x3d   : > { %s1553_s15 = sld [smem:[#allocation3 + $0x8]]  ;;  %v544_v37 = vstv %s1543_s0 }
  0x3e   : > { %1901 = sst [smem:[#allocation13_spill]] %s1545_s1 }
  0x3f   : > { %s1555_s10 = sld [smem:[#allocation5 + $0x8]]  ;;  %v552_v16 = vstv %s1547_s2 }
  0x40   : > { %467 = vmatpush.bf16.msra.mxu0 %v1251_v6  ;;  %835 = vmatpush.bf16.msra.mxu1 %v1251_v6  ;;  %s1557_s9 = sld [smem:[#allocation7 + $0x8]]  ;;  %v555_v44 = vstv %s1549_s4 }
  0x41   : > { %s1559_s16 = sld [smem:[#allocation3 + $0x9]] }
  0x42   : > { %1902 = sst [smem:[#allocation14_spill]] %s1551_s5 }
  0x43   : > { %s1561_s7 = sld [smem:[#allocation5 + $0x9]]  ;;  %v563_v45 = vstv %s1553_s15 }
  0x44   : > { %468 = vmatpush.bf16.msra.mxu0 %v1250_v7  ;;  %836 = vmatpush.bf16.msra.mxu1 %v1250_v7  ;;  %s1563_s8 = sld [smem:[#allocation7 + $0x9]] }
  0x45   : > { %1903 = sst [smem:[#allocation15_spill]] %s1555_s10 }
  0x46   : > { %1904 = sst [smem:[#allocation16_spill]] %s1557_s9 }
  0x47   : > { %469 = vmatmul.bf16.vlgmr.msra.gmra.mxu0 %v396_v8  ;;  %s1565_s6 = sld [smem:[#allocation3 + $0xa]]  ;;  %v574_v54 = vstv %s1559_s16 }
  0x48   : > { %s1567_s5 = sld [smem:[#allocation5 + $0xa]] }
  0x49   : > { %1905 = sst [smem:[#allocation17_spill]] %s1561_s7 }
  0x4a   : > { %1906 = sst [smem:[#allocation18_spill]] %s1563_s8 }
  0x4b   : > { %s1569_s1 = sld [smem:[#allocation7 + $0xa]] }
  0x4c   : > { %s1571_s10 = sld [smem:[#allocation3 + $0xb]] }
  0x4d   : > { %1907 = sst [smem:[#allocation19_spill]] %s1565_s6 }
  0x4e   : > { %1908 = sst [smem:[#allocation20_spill]] %s1567_s5 }
  0x4f   : > { %s1573_s9 = sld [smem:[#allocation5 + $0xb]] }
  0x50   : > { %s1575_s28 = sld [smem:[#allocation7 + $0xb]] }
  0x51   : > { %1909 = sst [smem:[#allocation21_spill]] %s1569_s1 }
  0x52   : > { %s1577_s7 = sld [smem:[#allocation3 + $0xc]]  ;;  %v596_v6 = vstv %s1571_s10 }
  0x53   : > { %s1579_s8 = sld [smem:[#allocation5 + $0xc]] }
  0x54   : > { %s1581_s6 = sld [smem:[#allocation7 + $0xc]] }
  0x55   : > { %1910 = sst [smem:[#allocation22_spill]] %s1573_s9 }
  0x56   : > { %1911 = sst [smem:[#allocation23_spill]] %s1575_s28 }
  0x57   : > { %s1583_s5 = sld [smem:[#allocation3 + $0xd]] }
  0x58   : > { %s1585_s1 = sld [smem:[#allocation5 + $0xd]] }
  0x59   : > { %s1591_s9 = sld [smem:[#allocation7 + $0xd]] }
  0x5a   : > { %s1597_s28 = sld [smem:[#allocation3 + $0xe]] }
  0x5b   : > { %s1605_s30 = sld [smem:[#allocation5 + $0xe]] }
  0x5c   : > { %s1611_s2 = sld [smem:[#allocation7 + $0xe]] }
  0x5d   : > { %s1617_s11 = sld [smem:[#allocation3 + $0xf]] }
  0x5e   : > { %s1619_s12 = sld [smem:[#allocation5 + $0xf]] }
  0x5f   : > { %s1625_s13 = sld [smem:[#allocation7 + $0xf]] }
  0x60   : > { %s1627_s14 = sld [smem:[#allocation3 + $0x10]] }
  0x61   : > { %s1633_s17 = sld [smem:[#allocation5 + $0x10]] }
  0x62   : > { %s1912_s0 = sld [smem:[#allocation12_spill]] }
  0x63   : > { %s1913_s3 = sld [smem:[#allocation15_spill]] }
  0x64   : > { %s1914_s18 = sld [smem:[#allocation19_spill]] }
  0x65   : > { %s1635_s20 = sld [smem:[#allocation7 + $0x10]] }
  0x66   : > { %s1640_s19 = sld [smem:[#allocation3 + $0x11]] }
  0x67   : > { %s1915_s4 = sld [smem:[#allocation13_spill]] }
  0x68   : > { %s1916_s15 = sld [smem:[#allocation17_spill]]  ;;  %v537_v59 = vstv %s1912_s0 }
  0x69   : > { %s1643_s21 = sld [smem:[#allocation5 + $0x11]]  ;;  %v566_v61 = vstv %s1913_s3 }
  0x6a   : > { %v585_v62 = vstv %s1914_s18  ;;  %s1648_s22 = sld [smem:[#allocation7 + $0x11]] }
  0x6b   : > { %s1917_s16 = sld [smem:[#allocation20_spill]] }
  0x6c   : > { %s1651_s23 = sld [smem:[#allocation3 + $0x12]] }
  0x6d   : > { %v548_v4 = vstv %s1915_s4  ;;  %s1656_s24 = sld [smem:[#allocation5 + $0x12]] }
  0x6e   : > { %v577_v5 = vstv %s1916_s15  ;;  %s1918_s25 = sld [smem:[#allocation14_spill]] }
  0x6f   : > { %s1919_s26 = sld [smem:[#allocation22_spill]] }
  0x70   : > { %s1659_s27 = sld [smem:[#allocation7 + $0x12]] }
  0x71   : > { %s1664_s29 = sld [smem:[#allocation3 + $0x13]] }
  0x72   : > { %s1920_s0 = sld [smem:[#allocation16_spill]] }
  0x73   : > { %s1667_s10 = sld [smem:[#allocation5 + $0x13]] }
  0x74   : > { %s1672_s3 = sld [smem:[#allocation7 + $0x13]] }
  0x75   : > { %s1681_s18 = sld [smem:[#allocation5 + $0x14]] }
  0x76   : > { %s1923_s4 = sld [smem:[#allocation23_spill]] }
  0x77   : > { %s1683_s15 = sld [smem:[#allocation7 + $0x14]] }
  0xc4   : > { %v1599_v17 = vpop.f32.mrf.mxu0 }
  0xc5   : > { %v476_v22 = vmul.f32 %v475_v9, %v1599_v17  ;;  %v487_v23 = vmul.f32 %v486_v10, %v1599_v17  ;;  %v498_v24 = vmul.f32 %v497_v11, %v1599_v17  ;;  %v509_v25 = vmul.f32 %v508_v12, %v1599_v17 }
  0xc6   : > { %v520_v26 = vmul.f32 %v519_v13, %v1599_v17  ;;  %v531_v28 = vmul.f32 %v530_v14, %v1599_v17  ;;  %v542_v36 = vmul.f32 %v541_v15, %v1599_v17  ;;  %v553_v43 = vmul.f32 %v552_v16, %v1599_v17 }
  0xc7   : > { %v479_v30 = vadd.f32 %v478_v18, %v476_v22  ;;  %v490_v31 = vadd.f32 %v489_v19, %v487_v23  ;;  %v501_v32 = vadd.f32 %v500_v20, %v498_v24  ;;  %v512_v33 = vadd.f32 %v511_v21, %v509_v25 }
  0xc8   : > { %v523_v41 = vadd.f32 %v522_v27, %v520_v26  ;;  %v534_v49 = vadd.f32 %v533_v29, %v531_v28  ;;  %v545_v53 = vadd.f32 %v544_v37, %v542_v36  ;;  %v564_v58 = vmul.f32 %v563_v45, %v1599_v17 }
  0xc9   : > { %v480_v38 = vmax.f32 %v479_v30, 0.0  ;;  %v491_v39 = vmax.f32 %v490_v31, 0.0  ;;  %v502_v40 = vmax.f32 %v501_v32, 0.0  ;;  %v513_v48 = vmax.f32 %v512_v33, 0.0 }
  0xca   : > { %v524_v57 = vmax.f32 %v523_v41, 0.0  ;;  %v556_v60 = vadd.f32 %v555_v44, %v553_v43  ;;  %v535_v1 = vmax.f32 %v534_v49, 0.0  ;;  %v575_v2 = vmul.f32 %v574_v54, %v1599_v17 }
  0xcb   : > { %v483_v46 = vmul.f32 %v482_v34, %v480_v38  ;;  %v494_v47 = vmul.f32 %v493_v35, %v491_v39  ;;  %v505_v56 = vmul.f32 %v504_v42, %v502_v40  ;;  %v516_v0 = vmul.f32 %v515_v51, %v513_v48 }
  0xcc   : > { %v472_v50 = vpop.f32.mrf.mxu0  ;;  %v546_v3 = vmax.f32 %v545_v53, 0.0  ;;  %v527_v8 = vmul.f32 %v526_v52, %v524_v57  ;;  %v567_v9 = vadd.f32 %v566_v61, %v564_v58  ;;  %v586_v10 = vmul.f32 %v585_v62, %v1599_v17 }
  0xcd   : > { %v495_v55 = vadd.f32 %v494_v47, %v483_v46  ;;  %v557_v11 = vmax.f32 %v556_v60, 0.0  ;;  %v588_v12 = vstv %s1917_s16  ;;  %v607_v13 = vstv %s1577_s7  ;;  %s1921_s7 = sld [smem:[#allocation18_spill]] }
  0xce   : > { %v618_v14 = vstv %s1583_s5  ;;  %v538_v16 = vmul.f32 %v537_v59, %v535_v1  ;;  %v578_v18 = vadd.f32 %v577_v5, %v575_v2  ;;  %v597_v19 = vmul.f32 %v596_v6, %v1599_v17  ;;  %s1675_s5 = sld [smem:[#allocation3 + $0x14]] }
  0xcf   : > { %v506_v63 = vadd.f32 %v505_v56, %v495_v55  ;;  %v549_v20 = vmul.f32 %v548_v4, %v546_v3  ;;  %v559_v21 = vstv %s1918_s25  ;;  %v599_v22 = vstv %s1919_s26  ;;  %s1696_s16 = sld [smem:[#allocation7 + $0x15]] }
  0xd0   : > { %v629_v23 = vstv %s1597_s28  ;;  %v568_v25 = vmax.f32 %v567_v9, 0.0  ;;  %v589_v26 = vadd.f32 %v588_v12, %v586_v10  ;;  %v608_v27 = vmul.f32 %v607_v13, %v1599_v17  ;;  %s1922_s28 = sld [smem:[#allocation21_spill]] }
  0xd1   : > { %v517_v7 = vadd.f32 %v516_v0, %v506_v63  ;;  %v570_v28 = vstv %s1920_s0  ;;  %v610_v29 = vstv %s1579_s8  ;;  %v619_v30 = vmul.f32 %v618_v14, %v1599_v17  ;;  %s1689_s8 = sld [smem:[#allocation3 + $0x15]] }
  0xd2   : > { %v621_v31 = vstv %s1585_s1  ;;  %v560_v33 = vmul.f32 %v559_v21, %v557_v11  ;;  %v579_v34 = vmax.f32 %v578_v18, 0.0  ;;  %v600_v35 = vadd.f32 %v599_v22, %v597_v19  ;;  %s1691_s1 = sld [smem:[#allocation5 + $0x15]] }
  0xd3   : > { %v528_v15 = vadd.f32 %v527_v8, %v517_v7  ;;  %v581_v36 = vstv %s1921_s7  ;;  %v630_v37 = vmul.f32 %v629_v23, %v1599_v17  ;;  %v632_v38 = vstv %s1605_s30  ;;  %s1699_s30 = sld [smem:[#allocation3 + $0x16]] }
  0xd4   : > { %v640_v39 = vstv %s1617_s11  ;;  %v571_v41 = vmul.f32 %v570_v28, %v568_v25  ;;  %v590_v42 = vmax.f32 %v589_v26, 0.0  ;;  %v611_v43 = vadd.f32 %v610_v29, %v608_v27  ;;  %s1704_s11 = sld [smem:[#allocation5 + $0x16]] }
  0xd5   : > { %v539_v24 = vadd.f32 %v538_v16, %v528_v15  ;;  %v603_v45 = vstv %s1923_s4  ;;  %v622_v46 = vadd.f32 %v621_v31, %v619_v30  ;;  %v651_v47 = vstv %s1627_s14  ;;  %s1707_s14 = sld [smem:[#allocation7 + $0x16]] }
  0xd6   : > { %v592_v44 = vstv %s1922_s28  ;;  %v582_v49 = vmul.f32 %v581_v36, %v579_v34  ;;  %v601_v50 = vmax.f32 %v600_v35, 0.0  ;;  %v641_v51 = vmul.f32 %v640_v39, %v1599_v17  ;;  %s1755_s25 = sld [smem:[#allocation5 + $0x1a]] }
  0xd7   : > { %v550_v32 = vadd.f32 %v549_v20, %v539_v24  ;;  %v614_v52 = vstv %s1581_s6  ;;  %v633_v53 = vadd.f32 %v632_v38, %v630_v37  ;;  %v643_v54 = vstv %s1619_s12  ;;  %s1712_s6 = sld [smem:[#allocation3 + $0x17]] }
  0xd8   : > { %v662_v55 = vstv %s1640_s19  ;;  %v593_v57 = vmul.f32 %v592_v44, %v590_v42  ;;  %v612_v58 = vmax.f32 %v611_v43, 0.0  ;;  %v652_v59 = vmul.f32 %v651_v47, %v1599_v17  ;;  %s1715_s12 = sld [smem:[#allocation5 + $0x17]] }
  0xd9   : > { %v561_v40 = vadd.f32 %v560_v33, %v550_v32  ;;  %v623_v60 = vmax.f32 %v622_v46, 0.0  ;;  %v625_v61 = vstv %s1591_s9  ;;  %v654_v62 = vstv %s1633_s17  ;;  %s1720_s19 = sld [smem:[#allocation7 + $0x17]] }
  0xda   : > { %v673_v63 = vstv %s1651_s23  ;;  %v604_v1 = vmul.f32 %v603_v45, %v601_v50  ;;  %v644_v2 = vadd.f32 %v643_v54, %v641_v51  ;;  %v663_v3 = vmul.f32 %v662_v55, %v1599_v17  ;;  %s1723_s9 = sld [smem:[#allocation3 + $0x18]] }
  0xdb   : > { %v572_v48 = vadd.f32 %v571_v41, %v561_v40  ;;  %v634_v4 = vmax.f32 %v633_v53, 0.0  ;;  %v665_v5 = vstv %s1643_s21  ;;  %v684_v6 = vstv %s1664_s29  ;;  %s1728_s17 = sld [smem:[#allocation5 + $0x18]] }
  0xdc   : > { %v695_v7 = vstv %s1675_s5  ;;  %v615_v9 = vmul.f32 %v614_v52, %v612_v58  ;;  %v655_v10 = vadd.f32 %v654_v62, %v652_v59  ;;  %v674_v11 = vmul.f32 %v673_v63, %v1599_v17  ;;  %s1731_s21 = sld [smem:[#allocation7 + $0x18]] }
  0xdd   : > { %v583_v56 = vadd.f32 %v582_v49, %v572_v48  ;;  %v626_v12 = vmul.f32 %v625_v61, %v623_v60  ;;  %v636_v13 = vstv %s1611_s2  ;;  %v676_v14 = vstv %s1656_s24  ;;  %s1737_s2 = sld [smem:[#allocation3 + $0x19]] }
  0xde   : > { %v706_v15 = vstv %s1689_s8  ;;  %v645_v18 = vmax.f32 %v644_v2, 0.0  ;;  %v666_v19 = vadd.f32 %v665_v5, %v663_v3  ;;  %v685_v20 = vmul.f32 %v684_v6, %v1599_v17  ;;  %s1739_s23 = sld [smem:[#allocation3 + $0x1a]] }
  0xdf   : > { %v594_v0 = vadd.f32 %v593_v57, %v583_v56  ;;  %v647_v21 = vstv %s1625_s13  ;;  %v687_v22 = vstv %s1667_s10  ;;  %v696_v23 = vmul.f32 %v695_v7, %v1599_v17  ;;  %s1745_s13 = sld [smem:[#allocation3 + $0x1b]] }
  0xe0   : > { %v698_v24 = vstv %s1681_s18  ;;  %v637_v26 = vmul.f32 %v636_v13, %v634_v4  ;;  %v656_v27 = vmax.f32 %v655_v10, 0.0  ;;  %v677_v28 = vadd.f32 %v676_v14, %v674_v11  ;;  %s1747_s24 = sld [smem:[#allocation5 + $0x19]] }
  0xe1   : > { %v605_v8 = vadd.f32 %v604_v1, %v594_v0  ;;  %v658_v29 = vstv %s1635_s20  ;;  %v707_v30 = vmul.f32 %v706_v15, %v1599_v17  ;;  %v709_v31 = vstv %s1691_s1  ;;  %s1752_s20 = sld [smem:[#allocation3 + $0x1c]] }
  0xe2   : > { %v717_v32 = vstv %s1699_s30  ;;  %v648_v34 = vmul.f32 %v647_v21, %v645_v18  ;;  %v667_v35 = vmax.f32 %v666_v19, 0.0  ;;  %v688_v36 = vadd.f32 %v687_v22, %v685_v20  ;;  %s1763_s26 = sld [smem:[#allocation5 + $0x1c]] }
  0xe3   : > { %v616_v16 = vadd.f32 %v615_v9, %v605_v8  ;;  %v669_v37 = vstv %s1648_s22  ;;  %v680_v38 = vstv %s1659_s27  ;;  %v699_v39 = vadd.f32 %v698_v24, %v696_v23  ;;  %s1760_s22 = sld [smem:[#allocation5 + $0x1b]] }
  0xe4   : > { %v728_v40 = vstv %s1712_s6  ;;  %v659_v42 = vmul.f32 %v658_v29, %v656_v27  ;;  %v678_v43 = vmax.f32 %v677_v28, 0.0  ;;  %v718_v44 = vmul.f32 %v717_v32, %v1599_v17  ;;  %s1768_s27 = sld [smem:[#allocation3 + $0x1d]] }
  0xe5   : > { %v627_v25 = vadd.f32 %v626_v12, %v616_v16  ;;  %v691_v45 = vstv %s1672_s3  ;;  %v710_v46 = vadd.f32 %v709_v31, %v707_v30  ;;  %v720_v47 = vstv %s1704_s11  ;;  %s1771_s29 = sld [smem:[#allocation7 + $0x19]] }
  0xe6   : > { %v739_v48 = vstv %s1723_s9  ;;  %v670_v50 = vmul.f32 %v669_v37, %v667_v35  ;;  %v689_v51 = vmax.f32 %v688_v36, 0.0  ;;  %v729_v52 = vmul.f32 %v728_v40, %v1599_v17  ;;  %s1924_s3 = sld [smem:[#allocation29_spill]] }
  0xe7   : > { %v638_v33 = vadd.f32 %v637_v26, %v627_v25  ;;  %v700_v53 = vmax.f32 %v699_v39, 0.0  ;;  %v702_v54 = vstv %s1683_s15  ;;  %v731_v55 = vstv %s1715_s12  ;;  %s1779_s7 = sld [smem:[#allocation3 + $0x1e]] }
  0xe8   : > { %v750_v56 = vstv %s1737_s2  ;;  %v681_v58 = vmul.f32 %v680_v38, %v678_v43  ;;  %v721_v59 = vadd.f32 %v720_v47, %v718_v44  ;;  %v740_v60 = vmul.f32 %v739_v48, %v1599_v17  ;;  %s1782_s5 = sld [smem:[#allocation5 + $0x1d]] }
  0xe9   : > { %v649_v41 = vadd.f32 %v648_v34, %v638_v33  ;;  %v711_v62 = vmax.f32 %v710_v46, 0.0  ;;  %v742_v63 = vstv %s1728_s17  ;;  %v761_v0 = vstv %s1739_s23  ;;  %s1790_s4 = sld [smem:[#allocation3 + $0x1f]] }
  0xea   : > { %v772_v1 = vstv %s1745_s13  ;;  %v692_v3 = vmul.f32 %v691_v45, %v689_v51  ;;  %v732_v4 = vadd.f32 %v731_v55, %v729_v52  ;;  %v751_v5 = vmul.f32 %v750_v56, %v1599_v17  ;;  %s1793_s15 = sld [smem:[#allocation7 + $0x1a]] }
  0xeb   : > { %v660_v49 = vadd.f32 %v659_v42, %v649_v41  ;;  %v703_v7 = vmul.f32 %v702_v54, %v700_v53  ;;  %v713_v8 = vstv %s1696_s16  ;;  %v753_v9 = vstv %s1747_s24  ;;  %s1799_s8 = sld [smem:[#allocation5 + $0x1e]] }
  0xec   : > { %v1265_v61 = vld [vmem:[%s1924_s3 + $0x38] sm:$0xff]  ;;  %v1264_v6 = vld [vmem:[%s1924_s3 + $0x30] sm:$0xff]  ;;  %v783_v10 = vstv %s1752_s20  ;;  %v722_v12 = vmax.f32 %v721_v59, 0.0  ;;  %v743_v13 = vadd.f32 %v742_v63, %v740_v60  ;;  %v762_v14 = vmul.f32 %v761_v0, %v1599_v17  ;;  %s1801_s1 = sld [smem:[#allocation7 + $0x1b]]  ;;  %v1263_v24 = vld [vmem:[%s1924_s3 + $0x28] sm:$0xff] }
  0xed   : > { %v671_v57 = vadd.f32 %v670_v50, %v660_v49  ;;  %911 = vmatpush.bf16.msra.mxu2 %v1265_v61  ;;  %v724_v15 = vstv %s1707_s14  ;;  %v764_v16 = vstv %s1755_s25  ;;  %v773_v18 = vmul.f32 %v772_v1, %v1599_v17  ;;  %s1810_s11 = sld [smem:[#allocation5 + $0x1f]]  ;;  %v1262_v40 = vld [vmem:[%s1924_s3 + $0x20] sm:$0xff]  ;;  %v1261_v56 = vld [vmem:[%s1924_s3 + $0x18] sm:$0xff] }
  0xee   : > { %v775_v19 = vstv %s1760_s22  ;;  %v714_v21 = vmul.f32 %v713_v8, %v711_v62  ;;  %v733_v22 = vmax.f32 %v732_v4, 0.0  ;;  %v754_v23 = vadd.f32 %v753_v9, %v751_v5  ;;  %s1813_s14 = sld [smem:[#allocation7 + $0x1c]] }
  0xef   : > { %v682_v2 = vadd.f32 %v681_v58, %v671_v57  ;;  %v735_v25 = vstv %s1720_s19  ;;  %v784_v26 = vmul.f32 %v783_v10, %v1599_v17  ;;  %v786_v27 = vstv %s1763_s26  ;;  %s1822_s19 = sld [smem:[#allocation7 + $0x1d]] }
  0xf0   : > { %v794_v28 = vstv %s1768_s27  ;;  %v725_v30 = vmul.f32 %v724_v15, %v722_v12  ;;  %v744_v31 = vmax.f32 %v743_v13, 0.0  ;;  %v765_v32 = vadd.f32 %v764_v16, %v762_v14  ;;  %s1828_s9 = sld [smem:[#allocation7 + $0x1e]]  ;;  %v1259_v12 = vld [vmem:[%s1924_s3 + $0x8] sm:$0xff] }
  0xf1   : > { %v693_v11 = vadd.f32 %v692_v3, %v682_v2  ;;  %912 = vmatpush.bf16.msra.mxu2 %v1264_v6  ;;  %v746_v33 = vstv %s1731_s21  ;;  %v776_v34 = vadd.f32 %v775_v19, %v773_v18  ;;  %v805_v35 = vstv %s1779_s7  ;;  %s1205_s2 = sld [smem:[#allocation7 + $0x1f]] }
  0xf2   : > { %v736_v37 = vmul.f32 %v735_v25, %v733_v22  ;;  %v755_v38 = vmax.f32 %v754_v23, 0.0  ;;  %v795_v39 = vmul.f32 %v794_v28, %v1599_v17  ;;  %v757_v41 = vstv %s1771_s29  ;;  %s827_s26 = sld [smem:[#allocation2]] }
  0xf3   : > { %v704_v20 = vadd.f32 %v703_v7, %v693_v11  ;;  %v787_v42 = vadd.f32 %v786_v27, %v784_v26  ;;  %v797_v43 = vstv %s1782_s5  ;;  %v816_v44 = vstv %s1790_s4  ;;  %s1925_s0 = sld [smem:[#allocation31_spill]] }
  0xf4   : > { %v747_v46 = vmul.f32 %v746_v33, %v744_v31  ;;  %v766_v47 = vmax.f32 %v765_v32, 0.0  ;;  %v806_v48 = vmul.f32 %v805_v35, %v1599_v17  ;;  %v768_v49 = vstv %s1793_s15  ;;  %s1926_s28 = sld [smem:[#allocation30_spill]] }
  0xf5   : > { %v715_v29 = vadd.f32 %v714_v21, %v704_v20  ;;  %913 = vmatpush.bf16.msra.mxu2 %v1263_v24  ;;  %v777_v50 = vmax.f32 %v776_v34, 0.0  ;;  %v808_v51 = vstv %s1799_s8  ;;  %v758_v53 = vmul.f32 %v757_v41, %v755_v38  ;;  %v1258_v21 = vld [vmem:[%s1924_s3] sm:$0xff]  ;;  %s1927_s4 = sld [smem:[#allocation11_spill]] }
  0xf6   : > { %v798_v54 = vadd.f32 %v797_v43, %v795_v39  ;;  %v817_v55 = vmul.f32 %v816_v44, %v1599_v17  ;;  %v779_v57 = vstv %s1801_s1  ;;  %v819_v58 = vstv %s1810_s11  ;;  %v1260_v17 = vld [vmem:[%s1924_s3 + $0x10] sm:$0xff]  ;;  %s1928_s1 = sld [smem:[#allocation32_spill]] }
  0xf7   : > { %v726_v36 = vadd.f32 %v725_v30, %v715_v29  ;;  %v769_v60 = vmul.f32 %v768_v49, %v766_v47  ;;  %v788_v61 = vmax.f32 %v787_v42, 0.0  ;;  %v809_v62 = vadd.f32 %v808_v51, %v806_v48 }
  0xf8   : > { %v790_v63 = vstv %s1813_s14  ;;  %v780_v1 = vmul.f32 %v779_v57, %v777_v50  ;;  %v799_v2 = vmax.f32 %v798_v54, 0.0  ;;  %v820_v3 = vadd.f32 %v819_v58, %v817_v55  ;;  %s1929_s14 = sld [smem:[#allocation33_spill]] }
  0xf9   : > { %v737_v45 = vadd.f32 %v736_v37, %v726_v36  ;;  %914 = vmatpush.bf16.msra.mxu2 %v1262_v40  ;;  %v801_v4 = vstv %s1822_s19  ;;  %v791_v6 = vmul.f32 %v790_v63, %v788_v61  ;;  %v810_v7 = vmax.f32 %v809_v62, 0.0  ;;  %v1267_v27 = vld [vmem:[%s1925_s0 + $0x8] sm:$0xff]  ;;  %v1266_v28 = vld [vmem:[%s1925_s0] sm:$0xff] }
  0xfa   : > { %v812_v8 = vstv %s1828_s9  ;;  %v802_v10 = vmul.f32 %v801_v4, %v799_v2  ;;  %v821_v11 = vmax.f32 %v820_v3, 0.0  ;;  %v823_v13 = vstv %s1205_s2  ;;  %956 = vmatpush.bf16.msra.mxu3 %v1267_v27  ;;  %v1307_v29 = vld [vmem:[%s1926_s28] ss:$0 sm:$0xff] }
  0xfb   : > { %v748_v52 = vadd.f32 %v747_v46, %v737_v45  ;;  %v813_v15 = vmul.f32 %v812_v8, %v810_v7  ;;  %v828_v22 = vstv %s827_s26  ;;  %s1080_s16 = sshll.u32 %s1927_s4, 3 }
  0xfc   : > { %v824_v18 = vmul.f32 %v823_v13, %v821_v11  ;;  %v1308_v35 = vld [vmem:[%s1928_s1] ss:$0 sm:$0xff] }
  0xfd   : > { %v759_v59 = vadd.f32 %v758_v53, %v748_v52  ;;  %915 = vmatpush.bf16.msra.mxu2 %v1261_v56 }
  0xfe   : > { %957 = vmatpush.bf16.msra.mxu3 %v1266_v28  ;;  %s394_s6 = scalar_lea.vmem %s1929_s14, %s1080_s16 }
  0xff   : > { %v770_v0 = vadd.f32 %v769_v60, %v759_v59 }
 0x101   : > { %v781_v5 = vadd.f32 %v780_v1, %v770_v0  ;;  %916 = vmatpush.bf16.msra.mxu2 %v1260_v17 }
 0x103   : > { %v792_v9 = vadd.f32 %v791_v6, %v781_v5 }
 0x105   : > { %v803_v14 = vadd.f32 %v802_v10, %v792_v9  ;;  %917 = vmatpush.bf16.msra.mxu2 %v1259_v12 }
 0x107   : > { %v814_v16 = vadd.f32 %v813_v15, %v803_v14 }
 0x109   : > { %v825_v19 = vadd.f32 %v824_v18, %v814_v16  ;;  %918 = vmatpush.bf16.msra.mxu2 %v1258_v21 }
 0x10b   : > { %v826_v20 = vpack.c.bf16 %v825_v19, %v825_v19 }
 0x10d   : > { %837 = vmatmul.bf16.vlgmr.msra.gmra.mxu1 %v826_v20 }
 0x18a   : > { %v838_v23 = vpop.f32.mrf.mxu1 }
 0x18b   : > { %v839_v24 = vadd.f32 %v838_v23, %v828_v22 }
 0x18d   : > { %v842_v25 = vpack.c.bf16 %v839_v24, %v839_v24 }
 0x18f   : > { %919 = vmatmul.bf16.vlgmr.msra.gmra.mxu2 %v842_v25 }
 0x192   : > { %v840_v26 = vpop.f32.mrf.mxu1 }
 0x212   : > { %v920_v30 = vpop.f32.mrf.mxu2 }
 0x213   : > { %v921_v31 = vadd.f32 %v1307_v29, %v920_v30 }
 0x215   : > { %v924_v32 = vmax.f32 %v921_v31, 0.0 }
 0x217   : > { %v925_v33 = vpack.c.bf16 %v924_v32, %v924_v32 }
 0x219   : > { %1246 = vmatmul.msk.bf16.vlgmr.msra.gmra.mxu3 %vm946_vm0, %v925_v33 }
 0x21a   : > { %v922_v34 = vpop.f32.mrf.mxu2 }
 0x29c   : > { %v959_v36 = vpop.f32.mrf.mxu3 }
 0x29d   : > { %v960_v37 = vadd.f32 %v1308_v35, %v959_v36 }
 0x29f   : > { %v1247_v38 = vmul.f32 -1.442695, %v960_v37 }
 0x2a1   : > { %1309 = vpow2.f32 %v1247_v38 }
 0x2a4   : > { %v961_v39 = vpop.f32.mrf.mxu3 }
 0x2a7   : > { %v1310_v40 = vpop.eup %1309 }
 0x2a8   : > { %v966_v41 = vadd.f32 1.0, %v1310_v40 }
 0x2aa   : > { %1311 = vrcp.f32 %v966_v41  ;;  %v978_v45 = vand.u32 2147483648, %v966_v41  ;;  %v976_v47 = vand.u32 2147483647, %v966_v41  ;;  %vm972_vm2 = vweird.f32 %v966_v41 }
 0x2ac   : > { %v979_v49 = vor.u32 1.1754944e-38, %v978_v45  ;;  %vm977_vm5 = vcmp.eq.f32.partialorder %v976_v47, 8.507059e+37 }
 0x2b0   : > { %v1312_v42 = vpop.eup %1311 }
 0x2b1   : > { %v968_v43 = vmul.f32 %v1312_v42, %v966_v41  ;;  %vm973_vm1 = vweird.f32 %v1312_v42 }
 0x2b2   : > { %vm974_vm3 = vmor %vm972_vm2, %vm973_vm1 }
 0x2b3   : > { %v969_v44 = vsub.f32 1.0, %v968_v43 }
 0x2b5   : > { %v970_v46 = vmul.f32 %v1312_v42, %v969_v44 }
 0x2b7   : > { %v971_v48 = vadd.f32 %v1312_v42, %v970_v46 }
 0x2b9   : > { %v975_v50 = vsel %vm974_vm3, %v1312_v42, %v971_v48 }
 0x2ba   : > { %v980_v51 = vsel %vm977_vm5, %v979_v49, %v975_v50 }
 0x2bb   : > { %983 = vst.msk [vmem:[%s394_s6] sm:$0xff] %vm982_vm4, %v980_v51 }
 0x2bc PF: > { %s1930_s12 = sld [smem:[#allocation10_spill]] }
 0x2c2   : > { %s23_s15 = sadd.s32 1, %s1930_s12  }
 0x2c3   : > { %p20_p7 = scmp.ge.s32.totalorder %s23_s15, 4  }
 0x2c5   :  { %22 = sbr.rel (!%p20_p7) target bundleno = 14 (0xe), region = 103 }
 0x2ca   :  { %1003 = vsyncpa [#allocation4], 1 }
 0x2cb   :  { %1005 = vsyncpa [#allocation4 + $0x1], 1 }
 0x2cc   :  { %1006 = vsyncpa [#allocation6], 1 }

</bundles_post_ra>
